<compile_context>
chip_gen: v5e
topology: v5e:2x2
jax: 0.10.0
libtpu: 0.0.40
codegen_flags: <defaults>
</compile_context>

<pallas_src>
import functools
import numpy as np

import jax
import jax.numpy as jnp
from jax.experimental import pallas as pl
from jax.experimental.pallas import tpu as pltpu


# ---------------------------------------------------------------------------
# Constant operators / masks (numpy at trace time; all tiny and static).
# ---------------------------------------------------------------------------
def _bilinear_matrix_1d(n_in, n_out):
    """(n_out, n_in) align_corners=True bilinear interpolation matrix."""
    M = np.zeros((n_out, n_in), np.float32)
    scale = 0.0 if n_out == 1 else (n_in - 1) / (n_out - 1)
    for i in range(n_out):
        src = i * scale
        lo = int(np.floor(src))
        hi = min(lo + 1, n_in - 1)
        f = src - lo
        M[i, lo] += 1.0 - f
        M[i, hi] += f
    return M


def _upsample_pad_operator(h1, w1, h2, w2):
    """(h1*w1, h2*w2) operator: x1_flat @ U == F.pad(bilinear_up2(x1)) flattened."""
    ho, wo = 2 * h1, 2 * w1
    assert h2 >= ho and w2 >= wo, "negative pad (crop) not supported"
    uy = _bilinear_matrix_1d(h1, ho)                    # (ho, h1)
    ux = _bilinear_matrix_1d(w1, wo)                    # (wo, w1)
    core = np.einsum("yh,xw->hwyx", uy, ux).reshape(h1 * w1, ho, wo)
    pad_t, pad_l = (h2 - ho) // 2, (w2 - wo) // 2
    U = np.zeros((h1 * w1, h2, w2), np.float32)
    U[:, pad_t:pad_t + ho, pad_l:pad_l + wo] = core
    return jnp.asarray(U.reshape(h1 * w1, h2 * w2))


def _tap_masks(h, w, bg):
    """(9, bg*h*w) 0/1 masks: in-bounds positions of each 3x3 tap for the
    flattened-HW lane layout with `bg` images folded along the lane axis.
    Positions where a lane-roll would wrap across rows / images / the array
    end are exactly the out-of-bounds ones, so the mask zeroes them."""
    ii, jj = np.meshgrid(np.arange(h), np.arange(w), indexing="ij")
    m = np.zeros((9, h * w), np.float32)
    for t in range(9):
        dy, dx = t // 3 - 1, t % 3 - 1
        ok = (ii + dy >= 0) & (ii + dy < h) & (jj + dx >= 0) & (jj + dx < w)
        m[t] = ok.reshape(-1).astype(np.float32)
    return jnp.asarray(np.tile(m, (1, bg)))


# ---------------------------------------------------------------------------
# Fused Pallas kernel: one grid step per batch group (group folded on lanes).
# ---------------------------------------------------------------------------
def _up_fused_kernel(x1_ref, x2_ref, u_ref, mask_ref,
                     w1_ref, b1_ref, w2_ref, b2_ref,
                     o_ref, xin_ref, *, w_img):
    # x1_ref : (1, Bg, C1, H1*W1)     x2_ref : (1, C2, N)   N = Bg*H2*W2
    # u_ref  : (H1*W1, H2*W2)         mask_ref: (9, N)
    # w1_ref : (9, Cmid, Cin)         b1_ref : (Cmid, 1)
    # w2_ref : (9, Cout, Cmid)        b2_ref : (Cout, 1)
    # o_ref  : (1, Cout, N)           xin_ref: VMEM scratch (Cin, N)
    f32 = jnp.float32
    bg = x1_ref.shape[1]
    c2 = x2_ref.shape[1]
    cin = xin_ref.shape[0]
    hw = u_ref.shape[1]
    n = x2_ref.shape[2]

    masks = mask_ref[...]                                       # (9, N)

    # Channel concat torch.cat([x2, up(x1)], dim=1), materialized once in
    # VMEM.  Bilinear upsample (align_corners=True) + diff pad = one small
    # MXU matmul per folded image; lane offsets are multiples of HW (aligned).
    xin_ref[0:c2, :] = x2_ref[0]
    for b in range(bg):
        xin_ref[c2:cin, b * hw:(b + 1) * hw] = jnp.dot(
            x1_ref[0, b], u_ref[...], preferred_element_type=f32)
    xin = xin_ref[...]                                          # (Cin, N)

    def conv3x3_bn_relu(x, w_ref, b_ref):
        # 3x3 SAME conv: 9 lane-rolls (XLU) + boundary masks (VPU) + per-tap
        # MXU contractions accumulated in registers (no im2col scratch).
        cout = w_ref.shape[1]
        acc = jnp.zeros((cout, n), f32)
        for t in range(9):
            dy, dx = t // 3 - 1, t % 3 - 1
            d = dy * w_img + dx
            xs = x if d == 0 else pltpu.roll(x, shift=(-d) % n, axis=1)
            if not (dy == 0 and dx == 0):
                xs = xs * masks[t:t + 1, :]
            acc = acc + jnp.dot(w_ref[t], xs, preferred_element_type=f32)
        return jnp.maximum(acc + b_ref[...], 0.0)

    h = conv3x3_bn_relu(xin, w1_ref, b1_ref)                    # (Cmid, N)
    y = conv3x3_bn_relu(h, w2_ref, b2_ref)                      # (Cout, N)
    o_ref[0] = y.astype(o_ref.dtype)


# ---------------------------------------------------------------------------
# Wrapper: single pallas_call, NCHW in / NCHW out.
# ---------------------------------------------------------------------------
def _pick_groups(batch):
    """One grid step per TensorCore: v7x has 2 TCs/chip -> split the batch
    across them; single-TC v5e/v6e fold the whole batch into lanes."""
    try:
        kind = jax.devices()[0].device_kind.lower()
    except Exception:
        kind = ""
    if batch % 2 == 0 and ("v7" in kind or "7x" in kind):
        return 2
    return 1


@functools.partial(jax.jit, static_argnames=("groups",))
def _up_forward_impl(x1_nchw, x2_nchw, w1, b1, w2, b2, *, groups):
    B, C1, H1, W1 = x1_nchw.shape
    _, C2, H2, W2 = x2_nchw.shape
    Cin = C1 + C2
    Cmid = w1.shape[1]
    Cout = w2.shape[1]
    HW = H2 * W2
    G = groups
    Bg = B // G
    N = Bg * HW

    U = _upsample_pad_operator(H1, W1, H2, W2)        # (H1*W1, HW) constant
    masks = _tap_masks(H2, W2, Bg)                    # (9, N) constant

    # x1: batch groups on the leading axis (upsample is per image in-kernel).
    x1f = x1_nchw.astype(jnp.float32).reshape(G, Bg, C1, H1 * W1)
    # x2: fold each group's images into the lane axis -> (G, C2, Bg*HW).
    x2f = (x2_nchw.astype(jnp.float32)
           .reshape(G, Bg, C2, HW).transpose(0, 2, 1, 3).reshape(G, C2, N))

    kernel = functools.partial(_up_fused_kernel, w_img=W2)

    out = pl.pallas_call(
        kernel,
        out_shape=jax.ShapeDtypeStruct((G, Cout, N), jnp.float32),
        grid=(G,),
        in_specs=[
            pl.BlockSpec((1, Bg, C1, H1 * W1), lambda g: (g, 0, 0, 0)),
            pl.BlockSpec((1, C2, N), lambda g: (g, 0, 0)),
            pl.BlockSpec((H1 * W1, HW), lambda g: (0, 0)),
            pl.BlockSpec((9, N), lambda g: (0, 0)),
            pl.BlockSpec((9, Cmid, Cin), lambda g: (0, 0, 0)),
            pl.BlockSpec((Cmid, 1), lambda g: (0, 0)),
            pl.BlockSpec((9, Cout, Cmid), lambda g: (0, 0, 0)),
            pl.BlockSpec((Cout, 1), lambda g: (0, 0)),
        ],
        out_specs=pl.BlockSpec((1, Cout, N), lambda g: (g, 0, 0)),
        scratch_shapes=[pltpu.VMEM((Cin, N), jnp.float32)],
        compiler_params=pltpu.CompilerParams(
            dimension_semantics=("parallel",)),
    )(x1f, x2f, U, masks, w1, b1, w2, b2)

    # (G, Cout, Bg*HW) -> (B, Cout, H2, W2)
    return (out.reshape(G, Cout, Bg, HW).transpose(0, 2, 1, 3)
               .reshape(B, Cout, H2, W2))


def up_forward(x1_nchw, x2_nchw, w1, b1, w2, b2):
    """Forward of Up(...). Inputs NCHW (PyTorch convention); returns NCHW."""
    return _up_forward_impl(x1_nchw, x2_nchw, w1, b1, w2, b2,
                            groups=_pick_groups(x1_nchw.shape[0]))


# ---------------------------------------------------------------------------
# Parameter setup: BN folding + per-tap weight packing.
# ---------------------------------------------------------------------------
def fold_bn(w_hwio, gamma, beta, mean, var, eps=1e-5):
    """Fold inference-mode BatchNorm into conv weight / per-channel bias."""
    s = gamma / jnp.sqrt(var + eps)
    return w_hwio * s[None, None, None, :], beta - mean * s


def pack_conv_weight(w_hwio):
    """(3,3,Cin,Cout) HWIO -> (9, Cout, Cin): one small matrix per 3x3 tap."""
    kh, kw, cin, cout = w_hwio.shape
    return jnp.transpose(w_hwio, (0, 1, 3, 2)).reshape(kh * kw, cout, cin)


def init_up_params(key, in_channels, out_channels):
    """Deterministic synthetic params for Up(in_channels, out_channels, bilinear=True)."""
    mid_channels = in_channels // 2
    ks = jax.random.split(key, 4)

    def conv_w(k, cin, cout):
        return 0.1 * jax.random.normal(k, (3, 3, cin, cout), jnp.float32)

    def bn(k, c):
        kg, kb, km, kv = jax.random.split(k, 4)
        return (jax.random.uniform(kg, (c,), jnp.float32, 0.5, 1.5),
                0.1 * jax.random.normal(kb, (c,), jnp.float32),
                0.1 * jax.random.normal(km, (c,), jnp.float32),
                jax.random.uniform(kv, (c,), jnp.float32, 0.5, 1.5))

    w1f, b1f = fold_bn(conv_w(ks[0], in_channels, mid_channels),
                       *bn(ks[2], mid_channels))
    w2f, b2f = fold_bn(conv_w(ks[1], mid_channels, out_channels),
                       *bn(ks[3], out_channels))

    params = {"w1": pack_conv_weight(w1f), "b1": b1f[:, None],
              "w2": pack_conv_weight(w2f), "b2": b2f[:, None]}
    ref_params = {"w1": w1f, "b1": b1f, "w2": w2f, "b2": b2f}
    return params, ref_params


# ---------------------------------------------------------------------------
# Pure-JAX reference (gather-based bilinear + lax.conv) for validation only.
# ---------------------------------------------------------------------------
def reference_up_forward(x1, x2, w1_hwio, b1, w2_hwio, b2):
    _, _, H1, W1 = x1.shape
    Ho, Wo = 2 * H1, 2 * W1

    def axis_interp(n_in, n_out):
        src = jnp.arange(n_out, dtype=jnp.float32) * ((n_in - 1) / (n_out - 1))
        lo = jnp.floor(src).astype(jnp.int32)
        hi = jnp.clip(lo + 1, 0, n_in - 1)
        return lo, hi, src - lo.astype(jnp.float32)

    y0, y1, fy = axis_interp(H1, Ho)
    c0, c1i, fx = axis_interp(W1, Wo)
    fy_ = fy[None, None, :, None]
    fx_ = fx[None, None, None, :]
    r0, r1 = x1[:, :, y0, :], x1[:, :, y1, :]
    top = r0[:, :, :, c0] * (1 - fx_) + r0[:, :, :, c1i] * fx_
    bot = r1[:, :, :, c0] * (1 - fx_) + r1[:, :, :, c1i] * fx_
    up = top * (1 - fy_) + bot * fy_

    H2, W2 = x2.shape[2], x2.shape[3]
    dY, dX = H2 - Ho, W2 - Wo
    up = jnp.pad(up, ((0, 0), (0, 0),
                      (dY // 2, dY - dY // 2), (dX // 2, dX - dX // 2)))
    x = jnp.concatenate([x2, up], axis=1)

    def conv_bn_relu(z, w_hwio, bias):
        y = jax.lax.conv_general_dilated(
            z, w_hwio, (1, 1), "SAME",
            dimension_numbers=("NCHW", "HWIO", "NCHW"),
            precision=jax.lax.Precision.HIGHEST)
        return jnp.maximum(y + bias[None, :, None, None], 0.0)

    return conv_bn_relu(conv_bn_relu(x, w1_hwio, b1), w2_hwio, b2)


if __name__ == "__main__":
    # Up(in_channels=8, out_channels=4, bilinear=True)
    # x1: deeper feature map (B, 4, 8, 8); x2: skip connection (B, 4, 16, 16)
    # concat -> 8 channels = in_channels.
    key = jax.random.PRNGKey(0)
    k1, k2, kp = jax.random.split(key, 3)

    x1 = jax.random.normal(k1, (2, 4, 8, 8), jnp.float32)
    x2 = jax.random.normal(k2, (2, 4, 16, 16), jnp.float32)

    params, ref_params = init_up_params(kp, in_channels=8, out_channels=4)

    out = up_forward(x1, x2, params["w1"], params["b1"],
                     params["w2"], params["b2"])
    jax.block_until_ready(out)
    assert out.shape == (2, 4, 16, 16), out.shape

    ref = reference_up_forward(x1, x2, ref_params["w1"], ref_params["b1"],
                               ref_params["w2"], ref_params["b2"])
    err = float(jnp.max(jnp.abs(out - ref)))
    assert err < 1e-3, f"max abs err vs reference: {err}"
    print("KERNEL_OK")
</pallas_src>

<mosaic_0001>
module attributes {stable_mosaic.version = 11 : i64} {
  func.func @_up_fused_kernel(%arg0: i32, %arg1: memref<1x2x4x64xf32, #tpu.memory_space<vmem>>, %arg2: memref<1x4x512xf32, #tpu.memory_space<vmem>>, %arg3: memref<64x256xf32, #tpu.memory_space<vmem>>, %arg4: memref<9x512xf32, #tpu.memory_space<vmem>>, %arg5: memref<9x4x8xf32, #tpu.memory_space<vmem>>, %arg6: memref<4x1xf32, #tpu.memory_space<vmem>>, %arg7: memref<9x4x4xf32, #tpu.memory_space<vmem>>, %arg8: memref<4x1xf32, #tpu.memory_space<vmem>>, %arg9: memref<1x4x512xf32, #tpu.memory_space<vmem>>, %arg10: memref<8x512xf32, #tpu.memory_space<vmem>>) attributes {dimension_semantics = [#tpu.dimension_semantics<parallel>], iteration_bounds = array<i64: 1>, scalar_prefetch = 0 : i64, scratch_operands = 1 : i64, tpu.core_type = #tpu.core_type<tc>, window_params = [{transform_indices = @transform_0, window_bounds = array<i64: 1, 2, 4, 64>}, {transform_indices = @transform_1, window_bounds = array<i64: 1, 4, 512>}, {pipeline_mode = #tpu.pipeline_mode<synchronous>, transform_indices = @transform_2, window_bounds = array<i64: 64, 256>}, {pipeline_mode = #tpu.pipeline_mode<synchronous>, transform_indices = @transform_3, window_bounds = array<i64: 9, 512>}, {pipeline_mode = #tpu.pipeline_mode<synchronous>, transform_indices = @transform_4, window_bounds = array<i64: 9, 4, 8>}, {pipeline_mode = #tpu.pipeline_mode<synchronous>, transform_indices = @transform_5, window_bounds = array<i64: 4, 1>}, {pipeline_mode = #tpu.pipeline_mode<synchronous>, transform_indices = @transform_6, window_bounds = array<i64: 9, 4, 4>}, {pipeline_mode = #tpu.pipeline_mode<synchronous>, transform_indices = @transform_7, window_bounds = array<i64: 4, 1>}, {transform_indices = @transform_8, window_bounds = array<i64: 1, 4, 512>}]} {
    %c0 = arith.constant 0 : index
    %c0_0 = arith.constant 0 : index
    %0 = vector.load %arg4[%c0, %c0_0] : memref<9x512xf32, #tpu.memory_space<vmem>>, vector<9x512xf32>
    %c0_1 = arith.constant 0 : index
    %c0_2 = arith.constant 0 : index
    %c0_3 = arith.constant 0 : index
    %1 = vector.load %arg2[%c0_1, %c0_2, %c0_3] : memref<1x4x512xf32, #tpu.memory_space<vmem>>, vector<1x4x512xf32>
    %2 = vector.shape_cast %1 : vector<1x4x512xf32> to vector<4x512xf32>
    %c0_4 = arith.constant 0 : index
    %c0_5 = arith.constant 0 : index
    %3 = vector.load %arg10[%c0_4, %c0_5] : memref<8x512xf32, #tpu.memory_space<vmem>>, vector<4x512xf32>
    tpu.vector_store %arg10[%c0_4, %c0_5], %2 {strides = array<i32>} : memref<8x512xf32, #tpu.memory_space<vmem>>, vector<4x512xf32>,
    %c0_6 = arith.constant 0 : index
    %c0_7 = arith.constant 0 : index
    %c0_8 = arith.constant 0 : index
    %c0_9 = arith.constant 0 : index
    %4 = vector.load %arg1[%c0_6, %c0_7, %c0_8, %c0_9] : memref<1x2x4x64xf32, #tpu.memory_space<vmem>>, vector<1x1x4x64xf32>
    %5 = vector.shape_cast %4 : vector<1x1x4x64xf32> to vector<4x64xf32>
    %c0_10 = arith.constant 0 : index
    %c0_11 = arith.constant 0 : index
    %6 = vector.load %arg3[%c0_10, %c0_11] : memref<64x256xf32, #tpu.memory_space<vmem>>, vector<64x256xf32>
    %cst = arith.constant dense<0.000000e+00> : vector<4x256xf32>
    %7 = tpu.matmul %5, %6, %cst {dimension_numbers = #tpu.dot_dimension_numbers<[1], [0], [0], [1], [0, 0, 1, 1], [], []>} : vector<4x64xf32>, vector<64x256xf32>, vector<4x256xf32> -> vector<4x256xf32>
    %c4 = arith.constant 4 : index
    %c0_12 = arith.constant 0 : index
    %8 = vector.load %arg10[%c4, %c0_12] : memref<8x512xf32, #tpu.memory_space<vmem>>, vector<4x256xf32>
    tpu.vector_store %arg10[%c4, %c0_12], %7 {strides = array<i32>} : memref<8x512xf32, #tpu.memory_space<vmem>>, vector<4x256xf32>,
    %c0_13 = arith.constant 0 : index
    %c1 = arith.constant 1 : index
    %c0_14 = arith.constant 0 : index
    %c0_15 = arith.constant 0 : index
    %9 = vector.load %arg1[%c0_13, %c1, %c0_14, %c0_15] : memref<1x2x4x64xf32, #tpu.memory_space<vmem>>, vector<1x1x4x64xf32>
    %10 = vector.shape_cast %9 : vector<1x1x4x64xf32> to vector<4x64xf32>
    %c0_16 = arith.constant 0 : index
    %c0_17 = arith.constant 0 : index
    %11 = vector.load %arg3[%c0_16, %c0_17] : memref<64x256xf32, #tpu.memory_space<vmem>>, vector<64x256xf32>
    %cst_18 = arith.constant dense<0.000000e+00> : vector<4x256xf32>
    %12 = tpu.matmul %10, %11, %cst_18 {dimension_numbers = #tpu.dot_dimension_numbers<[1], [0], [0], [1], [0, 0, 1, 1], [], []>} : vector<4x64xf32>, vector<64x256xf32>, vector<4x256xf32> -> vector<4x256xf32>
    %c4_19 = arith.constant 4 : index
    %c256 = arith.constant 256 : index
    %13 = vector.load %arg10[%c4_19, %c256] : memref<8x512xf32, #tpu.memory_space<vmem>>, vector<4x256xf32>
    tpu.vector_store %arg10[%c4_19, %c256], %12 {strides = array<i32>} : memref<8x512xf32, #tpu.memory_space<vmem>>, vector<4x256xf32>,
    %c0_20 = arith.constant 0 : index
    %c0_21 = arith.constant 0 : index
    %14 = vector.load %arg10[%c0_20, %c0_21] : memref<8x512xf32, #tpu.memory_space<vmem>>, vector<8x512xf32>
    %cst_22 = arith.constant 0.000000e+00 : f32
    %15 = vector.broadcast %cst_22 : f32 to vector<4x512xf32>
    %c17_i32 = arith.constant 17 : i32
    %16 = tpu.dynamic_rotate %14 by %c17_i32 dim 1 : vector<8x512xf32>, i32 -> vector<8x512xf32>
    %17 = vector.extract_strided_slice %0 {offsets = [0, 0], sizes = [1, 512], strides = [1, 1]} : vector<9x512xf32> to vector<1x512xf32>
    %18 = vector.broadcast %17 : vector<1x512xf32> to vector<8x512xf32>
    %19 = arith.mulf %16, %18 : vector<8x512xf32>
    %c0_23 = arith.constant 0 : index
    %c0_24 = arith.constant 0 : index
    %c0_25 = arith.constant 0 : index
    %20 = vector.load %arg5[%c0_23, %c0_24, %c0_25] : memref<9x4x8xf32, #tpu.memory_space<vmem>>, vector<1x4x8xf32>
    %21 = vector.shape_cast %20 : vector<1x4x8xf32> to vector<4x8xf32>
    %cst_26 = arith.constant dense<0.000000e+00> : vector<4x512xf32>
    %22 = tpu.matmul %21, %19, %cst_26 {dimension_numbers = #tpu.dot_dimension_numbers<[1], [0], [0], [1], [0, 0, 1, 1], [], []>} : vector<4x8xf32>, vector<8x512xf32>, vector<4x512xf32> -> vector<4x512xf32>
    %23 = arith.addf %15, %22 : vector<4x512xf32>
    %c16_i32 = arith.constant 16 : i32
    %24 = tpu.dynamic_rotate %14 by %c16_i32 dim 1 : vector<8x512xf32>, i32 -> vector<8x512xf32>
    %25 = vector.extract_strided_slice %0 {offsets = [1, 0], sizes = [1, 512], strides = [1, 1]} : vector<9x512xf32> to vector<1x512xf32>
    %26 = vector.broadcast %25 : vector<1x512xf32> to vector<8x512xf32>
    %27 = arith.mulf %24, %26 : vector<8x512xf32>
    %c1_27 = arith.constant 1 : index
    %c0_28 = arith.constant 0 : index
    %c0_29 = arith.constant 0 : index
    %28 = vector.load %arg5[%c1_27, %c0_28, %c0_29] : memref<9x4x8xf32, #tpu.memory_space<vmem>>, vector<1x4x8xf32>
    %29 = vector.shape_cast %28 : vector<1x4x8xf32> to vector<4x8xf32>
    %cst_30 = arith.constant dense<0.000000e+00> : vector<4x512xf32>
    %30 = tpu.matmul %29, %27, %cst_30 {dimension_numbers = #tpu.dot_dimension_numbers<[1], [0], [0], [1], [0, 0, 1, 1], [], []>} : vector<4x8xf32>, vector<8x512xf32>, vector<4x512xf32> -> vector<4x512xf32>
    %31 = arith.addf %23, %30 : vector<4x512xf32>
    %c15_i32 = arith.constant 15 : i32
    %32 = tpu.dynamic_rotate %14 by %c15_i32 dim 1 : vector<8x512xf32>, i32 -> vector<8x512xf32>
    %33 = vector.extract_strided_slice %0 {offsets = [2, 0], sizes = [1, 512], strides = [1, 1]} : vector<9x512xf32> to vector<1x512xf32>
    %34 = vector.broadcast %33 : vector<1x512xf32> to vector<8x512xf32>
    %35 = arith.mulf %32, %34 : vector<8x512xf32>
    %c2 = arith.constant 2 : index
    %c0_31 = arith.constant 0 : index
    %c0_32 = arith.constant 0 : index
    %36 = vector.load %arg5[%c2, %c0_31, %c0_32] : memref<9x4x8xf32, #tpu.memory_space<vmem>>, vector<1x4x8xf32>
    %37 = vector.shape_cast %36 : vector<1x4x8xf32> to vector<4x8xf32>
    %cst_33 = arith.constant dense<0.000000e+00> : vector<4x512xf32>
    %38 = tpu.matmul %37, %35, %cst_33 {dimension_numbers = #tpu.dot_dimension_numbers<[1], [0], [0], [1], [0, 0, 1, 1], [], []>} : vector<4x8xf32>, vector<8x512xf32>, vector<4x512xf32> -> vector<4x512xf32>
    %39 = arith.addf %31, %38 : vector<4x512xf32>
    %c1_i32 = arith.constant 1 : i32
    %40 = tpu.dynamic_rotate %14 by %c1_i32 dim 1 : vector<8x512xf32>, i32 -> vector<8x512xf32>
    %41 = vector.extract_strided_slice %0 {offsets = [3, 0], sizes = [1, 512], strides = [1, 1]} : vector<9x512xf32> to vector<1x512xf32>
    %42 = vector.broadcast %41 : vector<1x512xf32> to vector<8x512xf32>
    %43 = arith.mulf %40, %42 : vector<8x512xf32>
    %c3 = arith.constant 3 : index
    %c0_34 = arith.constant 0 : index
    %c0_35 = arith.constant 0 : index
    %44 = vector.load %arg5[%c3, %c0_34, %c0_35] : memref<9x4x8xf32, #tpu.memory_space<vmem>>, vector<1x4x8xf32>
    %45 = vector.shape_cast %44 : vector<1x4x8xf32> to vector<4x8xf32>
    %cst_36 = arith.constant dense<0.000000e+00> : vector<4x512xf32>
    %46 = tpu.matmul %45, %43, %cst_36 {dimension_numbers = #tpu.dot_dimension_numbers<[1], [0], [0], [1], [0, 0, 1, 1], [], []>} : vector<4x8xf32>, vector<8x512xf32>, vector<4x512xf32> -> vector<4x512xf32>
    %47 = arith.addf %39, %46 : vector<4x512xf32>
    %c4_37 = arith.constant 4 : index
    %c0_38 = arith.constant 0 : index
    %c0_39 = arith.constant 0 : index
    %48 = vector.load %arg5[%c4_37, %c0_38, %c0_39] : memref<9x4x8xf32, #tpu.memory_space<vmem>>, vector<1x4x8xf32>
    %49 = vector.shape_cast %48 : vector<1x4x8xf32> to vector<4x8xf32>
    %cst_40 = arith.constant dense<0.000000e+00> : vector<4x512xf32>
    %50 = tpu.matmul %49, %14, %cst_40 {dimension_numbers = #tpu.dot_dimension_numbers<[1], [0], [0], [1], [0, 0, 1, 1], [], []>} : vector<4x8xf32>, vector<8x512xf32>, vector<4x512xf32> -> vector<4x512xf32>
    %51 = arith.addf %47, %50 : vector<4x512xf32>
    %c511_i32 = arith.constant 511 : i32
    %52 = tpu.dynamic_rotate %14 by %c511_i32 dim 1 : vector<8x512xf32>, i32 -> vector<8x512xf32>
    %53 = vector.extract_strided_slice %0 {offsets = [5, 0], sizes = [1, 512], strides = [1, 1]} : vector<9x512xf32> to vector<1x512xf32>
    %54 = vector.broadcast %53 : vector<1x512xf32> to vector<8x512xf32>
    %55 = arith.mulf %52, %54 : vector<8x512xf32>
    %c5 = arith.constant 5 : index
    %c0_41 = arith.constant 0 : index
    %c0_42 = arith.constant 0 : index
    %56 = vector.load %arg5[%c5, %c0_41, %c0_42] : memref<9x4x8xf32, #tpu.memory_space<vmem>>, vector<1x4x8xf32>
    %57 = vector.shape_cast %56 : vector<1x4x8xf32> to vector<4x8xf32>
    %cst_43 = arith.constant dense<0.000000e+00> : vector<4x512xf32>
    %58 = tpu.matmul %57, %55, %cst_43 {dimension_numbers = #tpu.dot_dimension_numbers<[1], [0], [0], [1], [0, 0, 1, 1], [], []>} : vector<4x8xf32>, vector<8x512xf32>, vector<4x512xf32> -> vector<4x512xf32>
    %59 = arith.addf %51, %58 : vector<4x512xf32>
    %c497_i32 = arith.constant 497 : i32
    %60 = tpu.dynamic_rotate %14 by %c497_i32 dim 1 : vector<8x512xf32>, i32 -> vector<8x512xf32>
    %61 = vector.extract_strided_slice %0 {offsets = [6, 0], sizes = [1, 512], strides = [1, 1]} : vector<9x512xf32> to vector<1x512xf32>
    %62 = vector.broadcast %61 : vector<1x512xf32> to vector<8x512xf32>
    %63 = arith.mulf %60, %62 : vector<8x512xf32>
    %c6 = arith.constant 6 : index
    %c0_44 = arith.constant 0 : index
    %c0_45 = arith.constant 0 : index
    %64 = vector.load %arg5[%c6, %c0_44, %c0_45] : memref<9x4x8xf32, #tpu.memory_space<vmem>>, vector<1x4x8xf32>
    %65 = vector.shape_cast %64 : vector<1x4x8xf32> to vector<4x8xf32>
    %cst_46 = arith.constant dense<0.000000e+00> : vector<4x512xf32>
    %66 = tpu.matmul %65, %63, %cst_46 {dimension_numbers = #tpu.dot_dimension_numbers<[1], [0], [0], [1], [0, 0, 1, 1], [], []>} : vector<4x8xf32>, vector<8x512xf32>, vector<4x512xf32> -> vector<4x512xf32>
    %67 = arith.addf %59, %66 : vector<4x512xf32>
    %c496_i32 = arith.constant 496 : i32
    %68 = tpu.dynamic_rotate %14 by %c496_i32 dim 1 : vector<8x512xf32>, i32 -> vector<8x512xf32>
    %69 = vector.extract_strided_slice %0 {offsets = [7, 0], sizes = [1, 512], strides = [1, 1]} : vector<9x512xf32> to vector<1x512xf32>
    %70 = vector.broadcast %69 : vector<1x512xf32> to vector<8x512xf32>
    %71 = arith.mulf %68, %70 : vector<8x512xf32>
    %c7 = arith.constant 7 : index
    %c0_47 = arith.constant 0 : index
    %c0_48 = arith.constant 0 : index
    %72 = vector.load %arg5[%c7, %c0_47, %c0_48] : memref<9x4x8xf32, #tpu.memory_space<vmem>>, vector<1x4x8xf32>
    %73 = vector.shape_cast %72 : vector<1x4x8xf32> to vector<4x8xf32>
    %cst_49 = arith.constant dense<0.000000e+00> : vector<4x512xf32>
    %74 = tpu.matmul %73, %71, %cst_49 {dimension_numbers = #tpu.dot_dimension_numbers<[1], [0], [0], [1], [0, 0, 1, 1], [], []>} : vector<4x8xf32>, vector<8x512xf32>, vector<4x512xf32> -> vector<4x512xf32>
    %75 = arith.addf %67, %74 : vector<4x512xf32>
    %c495_i32 = arith.constant 495 : i32
    %76 = tpu.dynamic_rotate %14 by %c495_i32 dim 1 : vector<8x512xf32>, i32 -> vector<8x512xf32>
    %77 = vector.extract_strided_slice %0 {offsets = [8, 0], sizes = [1, 512], strides = [1, 1]} : vector<9x512xf32> to vector<1x512xf32>
    %78 = vector.broadcast %77 : vector<1x512xf32> to vector<8x512xf32>
    %79 = arith.mulf %76, %78 : vector<8x512xf32>
    %c8 = arith.constant 8 : index
    %c0_50 = arith.constant 0 : index
    %c0_51 = arith.constant 0 : index
    %80 = vector.load %arg5[%c8, %c0_50, %c0_51] : memref<9x4x8xf32, #tpu.memory_space<vmem>>, vector<1x4x8xf32>
    %81 = vector.shape_cast %80 : vector<1x4x8xf32> to vector<4x8xf32>
    %cst_52 = arith.constant dense<0.000000e+00> : vector<4x512xf32>
    %82 = tpu.matmul %81, %79, %cst_52 {dimension_numbers = #tpu.dot_dimension_numbers<[1], [0], [0], [1], [0, 0, 1, 1], [], []>} : vector<4x8xf32>, vector<8x512xf32>, vector<4x512xf32> -> vector<4x512xf32>
    %83 = arith.addf %75, %82 : vector<4x512xf32>
    %c0_53 = arith.constant 0 : index
    %c0_54 = arith.constant 0 : index
    %84 = vector.load %arg6[%c0_53, %c0_54] : memref<4x1xf32, #tpu.memory_space<vmem>>, vector<4x1xf32>
    %85 = vector.broadcast %84 : vector<4x1xf32> to vector<4x512xf32>
    %86 = arith.addf %83, %85 : vector<4x512xf32>
    %cst_55 = arith.constant 0.000000e+00 : f32
    %87 = vector.broadcast %cst_55 : f32 to vector<4x512xf32>
    %88 = arith.maximumf %86, %87 : vector<4x512xf32>
    %cst_56 = arith.constant 0.000000e+00 : f32
    %89 = vector.broadcast %cst_56 : f32 to vector<4x512xf32>
    %c17_i32_57 = arith.constant 17 : i32
    %90 = tpu.dynamic_rotate %88 by %c17_i32_57 dim 1 : vector<4x512xf32>, i32 -> vector<4x512xf32>
    %91 = vector.extract_strided_slice %0 {offsets = [0, 0], sizes = [1, 512], strides = [1, 1]} : vector<9x512xf32> to vector<1x512xf32>
    %92 = vector.broadcast %91 : vector<1x512xf32> to vector<4x512xf32>
    %93 = arith.mulf %90, %92 : vector<4x512xf32>
    %c0_58 = arith.constant 0 : index
    %c0_59 = arith.constant 0 : index
    %c0_60 = arith.constant 0 : index
    %94 = vector.load %arg7[%c0_58, %c0_59, %c0_60] : memref<9x4x4xf32, #tpu.memory_space<vmem>>, vector<1x4x4xf32>
    %95 = vector.shape_cast %94 : vector<1x4x4xf32> to vector<4x4xf32>
    %cst_61 = arith.constant dense<0.000000e+00> : vector<4x512xf32>
    %96 = tpu.matmul %95, %93, %cst_61 {dimension_numbers = #tpu.dot_dimension_numbers<[1], [0], [0], [1], [0, 0, 1, 1], [], []>} : vector<4x4xf32>, vector<4x512xf32>, vector<4x512xf32> -> vector<4x512xf32>
    %97 = arith.addf %89, %96 : vector<4x512xf32>
    %c16_i32_62 = arith.constant 16 : i32
    %98 = tpu.dynamic_rotate %88 by %c16_i32_62 dim 1 : vector<4x512xf32>, i32 -> vector<4x512xf32>
    %99 = vector.extract_strided_slice %0 {offsets = [1, 0], sizes = [1, 512], strides = [1, 1]} : vector<9x512xf32> to vector<1x512xf32>
    %100 = vector.broadcast %99 : vector<1x512xf32> to vector<4x512xf32>
    %101 = arith.mulf %98, %100 : vector<4x512xf32>
    %c1_63 = arith.constant 1 : index
    %c0_64 = arith.constant 0 : index
    %c0_65 = arith.constant 0 : index
    %102 = vector.load %arg7[%c1_63, %c0_64, %c0_65] : memref<9x4x4xf32, #tpu.memory_space<vmem>>, vector<1x4x4xf32>
    %103 = vector.shape_cast %102 : vector<1x4x4xf32> to vector<4x4xf32>
    %cst_66 = arith.constant dense<0.000000e+00> : vector<4x512xf32>
    %104 = tpu.matmul %103, %101, %cst_66 {dimension_numbers = #tpu.dot_dimension_numbers<[1], [0], [0], [1], [0, 0, 1, 1], [], []>} : vector<4x4xf32>, vector<4x512xf32>, vector<4x512xf32> -> vector<4x512xf32>
    %105 = arith.addf %97, %104 : vector<4x512xf32>
    %c15_i32_67 = arith.constant 15 : i32
    %106 = tpu.dynamic_rotate %88 by %c15_i32_67 dim 1 : vector<4x512xf32>, i32 -> vector<4x512xf32>
    %107 = vector.extract_strided_slice %0 {offsets = [2, 0], sizes = [1, 512], strides = [1, 1]} : vector<9x512xf32> to vector<1x512xf32>
    %108 = vector.broadcast %107 : vector<1x512xf32> to vector<4x512xf32>
    %109 = arith.mulf %106, %108 : vector<4x512xf32>
    %c2_68 = arith.constant 2 : index
    %c0_69 = arith.constant 0 : index
    %c0_70 = arith.constant 0 : index
    %110 = vector.load %arg7[%c2_68, %c0_69, %c0_70] : memref<9x4x4xf32, #tpu.memory_space<vmem>>, vector<1x4x4xf32>
    %111 = vector.shape_cast %110 : vector<1x4x4xf32> to vector<4x4xf32>
    %cst_71 = arith.constant dense<0.000000e+00> : vector<4x512xf32>
    %112 = tpu.matmul %111, %109, %cst_71 {dimension_numbers = #tpu.dot_dimension_numbers<[1], [0], [0], [1], [0, 0, 1, 1], [], []>} : vector<4x4xf32>, vector<4x512xf32>, vector<4x512xf32> -> vector<4x512xf32>
    %113 = arith.addf %105, %112 : vector<4x512xf32>
    %c1_i32_72 = arith.constant 1 : i32
    %114 = tpu.dynamic_rotate %88 by %c1_i32_72 dim 1 : vector<4x512xf32>, i32 -> vector<4x512xf32>
    %115 = vector.extract_strided_slice %0 {offsets = [3, 0], sizes = [1, 512], strides = [1, 1]} : vector<9x512xf32> to vector<1x512xf32>
    %116 = vector.broadcast %115 : vector<1x512xf32> to vector<4x512xf32>
    %117 = arith.mulf %114, %116 : vector<4x512xf32>
    %c3_73 = arith.constant 3 : index
    %c0_74 = arith.constant 0 : index
    %c0_75 = arith.constant 0 : index
    %118 = vector.load %arg7[%c3_73, %c0_74, %c0_75] : memref<9x4x4xf32, #tpu.memory_space<vmem>>, vector<1x4x4xf32>
    %119 = vector.shape_cast %118 : vector<1x4x4xf32> to vector<4x4xf32>
    %cst_76 = arith.constant dense<0.000000e+00> : vector<4x512xf32>
    %120 = tpu.matmul %119, %117, %cst_76 {dimension_numbers = #tpu.dot_dimension_numbers<[1], [0], [0], [1], [0, 0, 1, 1], [], []>} : vector<4x4xf32>, vector<4x512xf32>, vector<4x512xf32> -> vector<4x512xf32>
    %121 = arith.addf %113, %120 : vector<4x512xf32>
    %c4_77 = arith.constant 4 : index
    %c0_78 = arith.constant 0 : index
    %c0_79 = arith.constant 0 : index
    %122 = vector.load %arg7[%c4_77, %c0_78, %c0_79] : memref<9x4x4xf32, #tpu.memory_space<vmem>>, vector<1x4x4xf32>
    %123 = vector.shape_cast %122 : vector<1x4x4xf32> to vector<4x4xf32>
    %cst_80 = arith.constant dense<0.000000e+00> : vector<4x512xf32>
    %124 = tpu.matmul %123, %88, %cst_80 {dimension_numbers = #tpu.dot_dimension_numbers<[1], [0], [0], [1], [0, 0, 1, 1], [], []>} : vector<4x4xf32>, vector<4x512xf32>, vector<4x512xf32> -> vector<4x512xf32>
    %125 = arith.addf %121, %124 : vector<4x512xf32>
    %c511_i32_81 = arith.constant 511 : i32
    %126 = tpu.dynamic_rotate %88 by %c511_i32_81 dim 1 : vector<4x512xf32>, i32 -> vector<4x512xf32>
    %127 = vector.extract_strided_slice %0 {offsets = [5, 0], sizes = [1, 512], strides = [1, 1]} : vector<9x512xf32> to vector<1x512xf32>
    %128 = vector.broadcast %127 : vector<1x512xf32> to vector<4x512xf32>
    %129 = arith.mulf %126, %128 : vector<4x512xf32>
    %c5_82 = arith.constant 5 : index
    %c0_83 = arith.constant 0 : index
    %c0_84 = arith.constant 0 : index
    %130 = vector.load %arg7[%c5_82, %c0_83, %c0_84] : memref<9x4x4xf32, #tpu.memory_space<vmem>>, vector<1x4x4xf32>
    %131 = vector.shape_cast %130 : vector<1x4x4xf32> to vector<4x4xf32>
    %cst_85 = arith.constant dense<0.000000e+00> : vector<4x512xf32>
    %132 = tpu.matmul %131, %129, %cst_85 {dimension_numbers = #tpu.dot_dimension_numbers<[1], [0], [0], [1], [0, 0, 1, 1], [], []>} : vector<4x4xf32>, vector<4x512xf32>, vector<4x512xf32> -> vector<4x512xf32>
    %133 = arith.addf %125, %132 : vector<4x512xf32>
    %c497_i32_86 = arith.constant 497 : i32
    %134 = tpu.dynamic_rotate %88 by %c497_i32_86 dim 1 : vector<4x512xf32>, i32 -> vector<4x512xf32>
    %135 = vector.extract_strided_slice %0 {offsets = [6, 0], sizes = [1, 512], strides = [1, 1]} : vector<9x512xf32> to vector<1x512xf32>
    %136 = vector.broadcast %135 : vector<1x512xf32> to vector<4x512xf32>
    %137 = arith.mulf %134, %136 : vector<4x512xf32>
    %c6_87 = arith.constant 6 : index
    %c0_88 = arith.constant 0 : index
    %c0_89 = arith.constant 0 : index
    %138 = vector.load %arg7[%c6_87, %c0_88, %c0_89] : memref<9x4x4xf32, #tpu.memory_space<vmem>>, vector<1x4x4xf32>
    %139 = vector.shape_cast %138 : vector<1x4x4xf32> to vector<4x4xf32>
    %cst_90 = arith.constant dense<0.000000e+00> : vector<4x512xf32>
    %140 = tpu.matmul %139, %137, %cst_90 {dimension_numbers = #tpu.dot_dimension_numbers<[1], [0], [0], [1], [0, 0, 1, 1], [], []>} : vector<4x4xf32>, vector<4x512xf32>, vector<4x512xf32> -> vector<4x512xf32>
    %141 = arith.addf %133, %140 : vector<4x512xf32>
    %c496_i32_91 = arith.constant 496 : i32
    %142 = tpu.dynamic_rotate %88 by %c496_i32_91 dim 1 : vector<4x512xf32>, i32 -> vector<4x512xf32>
    %143 = vector.extract_strided_slice %0 {offsets = [7, 0], sizes = [1, 512], strides = [1, 1]} : vector<9x512xf32> to vector<1x512xf32>
    %144 = vector.broadcast %143 : vector<1x512xf32> to vector<4x512xf32>
    %145 = arith.mulf %142, %144 : vector<4x512xf32>
    %c7_92 = arith.constant 7 : index
    %c0_93 = arith.constant 0 : index
    %c0_94 = arith.constant 0 : index
    %146 = vector.load %arg7[%c7_92, %c0_93, %c0_94] : memref<9x4x4xf32, #tpu.memory_space<vmem>>, vector<1x4x4xf32>
    %147 = vector.shape_cast %146 : vector<1x4x4xf32> to vector<4x4xf32>
    %cst_95 = arith.constant dense<0.000000e+00> : vector<4x512xf32>
    %148 = tpu.matmul %147, %145, %cst_95 {dimension_numbers = #tpu.dot_dimension_numbers<[1], [0], [0], [1], [0, 0, 1, 1], [], []>} : vector<4x4xf32>, vector<4x512xf32>, vector<4x512xf32> -> vector<4x512xf32>
    %149 = arith.addf %141, %148 : vector<4x512xf32>
    %c495_i32_96 = arith.constant 495 : i32
    %150 = tpu.dynamic_rotate %88 by %c495_i32_96 dim 1 : vector<4x512xf32>, i32 -> vector<4x512xf32>
    %151 = vector.extract_strided_slice %0 {offsets = [8, 0], sizes = [1, 512], strides = [1, 1]} : vector<9x512xf32> to vector<1x512xf32>
    %152 = vector.broadcast %151 : vector<1x512xf32> to vector<4x512xf32>
    %153 = arith.mulf %150, %152 : vector<4x512xf32>
    %c8_97 = arith.constant 8 : index
    %c0_98 = arith.constant 0 : index
    %c0_99 = arith.constant 0 : index
    %154 = vector.load %arg7[%c8_97, %c0_98, %c0_99] : memref<9x4x4xf32, #tpu.memory_space<vmem>>, vector<1x4x4xf32>
    %155 = vector.shape_cast %154 : vector<1x4x4xf32> to vector<4x4xf32>
    %cst_100 = arith.constant dense<0.000000e+00> : vector<4x512xf32>
    %156 = tpu.matmul %155, %153, %cst_100 {dimension_numbers = #tpu.dot_dimension_numbers<[1], [0], [0], [1], [0, 0, 1, 1], [], []>} : vector<4x4xf32>, vector<4x512xf32>, vector<4x512xf32> -> vector<4x512xf32>
    %157 = arith.addf %149, %156 : vector<4x512xf32>
    %c0_101 = arith.constant 0 : index
    %c0_102 = arith.constant 0 : index
    %158 = vector.load %arg8[%c0_101, %c0_102] : memref<4x1xf32, #tpu.memory_space<vmem>>, vector<4x1xf32>
    %159 = vector.broadcast %158 : vector<4x1xf32> to vector<4x512xf32>
    %160 = arith.addf %157, %159 : vector<4x512xf32>
    %cst_103 = arith.constant 0.000000e+00 : f32
    %161 = vector.broadcast %cst_103 : f32 to vector<4x512xf32>
    %162 = arith.maximumf %160, %161 : vector<4x512xf32>
    %c0_104 = arith.constant 0 : index
    %c0_105 = arith.constant 0 : index
    %c0_106 = arith.constant 0 : index
    %163 = vector.load %arg9[%c0_104, %c0_105, %c0_106] : memref<1x4x512xf32, #tpu.memory_space<vmem>>, vector<1x4x512xf32>
    %164 = vector.shape_cast %163 : vector<1x4x512xf32> to vector<4x512xf32>
    %165 = vector.shape_cast %162 : vector<4x512xf32> to vector<1x4x512xf32>
    tpu.vector_store %arg9[%c0_104, %c0_105, %c0_106], %165 {strides = array<i32>} : memref<1x4x512xf32, #tpu.memory_space<vmem>>, vector<1x4x512xf32>,
    return
  }
  func.func @transform_0(%arg0: i32) -> (i32, i32, i32, i32) {
    %c0_i32 = arith.constant 0 : i32
    %c0_i32_0 = arith.constant 0 : i32
    %c0_i32_1 = arith.constant 0 : i32
    %c0_i32_2 = arith.constant 0 : i32
    return %arg0, %c0_i32, %c0_i32_0, %c0_i32_1 : i32, i32, i32, i32
  }
  func.func @transform_1(%arg0: i32) -> (i32, i32, i32) {
    %c0_i32 = arith.constant 0 : i32
    %c0_i32_0 = arith.constant 0 : i32
    %c0_i32_1 = arith.constant 0 : i32
    return %arg0, %c0_i32, %c0_i32_0 : i32, i32, i32
  }
  func.func @transform_2(%arg0: i32) -> (i32, i32) {
    %c0_i32 = arith.constant 0 : i32
    %c0_i32_0 = arith.constant 0 : i32
    %c0_i32_1 = arith.constant 0 : i32
    return %c0_i32, %c0_i32_0 : i32, i32
  }
  func.func @transform_3(%arg0: i32) -> (i32, i32) {
    %c0_i32 = arith.constant 0 : i32
    %c0_i32_0 = arith.constant 0 : i32
    %c0_i32_1 = arith.constant 0 : i32
    return %c0_i32, %c0_i32_0 : i32, i32
  }
  func.func @transform_4(%arg0: i32) -> (i32, i32, i32) {
    %c0_i32 = arith.constant 0 : i32
    %c0_i32_0 = arith.constant 0 : i32
    %c0_i32_1 = arith.constant 0 : i32
    %c0_i32_2 = arith.constant 0 : i32
    return %c0_i32, %c0_i32_0, %c0_i32_1 : i32, i32, i32
  }
  func.func @transform_5(%arg0: i32) -> (i32, i32) {
    %c0_i32 = arith.constant 0 : i32
    %c0_i32_0 = arith.constant 0 : i32
    %c0_i32_1 = arith.constant 0 : i32
    return %c0_i32, %c0_i32_0 : i32, i32
  }
  func.func @transform_6(%arg0: i32) -> (i32, i32, i32) {
    %c0_i32 = arith.constant 0 : i32
    %c0_i32_0 = arith.constant 0 : i32
    %c0_i32_1 = arith.constant 0 : i32
    %c0_i32_2 = arith.constant 0 : i32
    return %c0_i32, %c0_i32_0, %c0_i32_1 : i32, i32, i32
  }
  func.func @transform_7(%arg0: i32) -> (i32, i32) {
    %c0_i32 = arith.constant 0 : i32
    %c0_i32_0 = arith.constant 0 : i32
    %c0_i32_1 = arith.constant 0 : i32
    return %c0_i32, %c0_i32_0 : i32, i32
  }
  func.func @transform_8(%arg0: i32) -> (i32, i32, i32) {
    %c0_i32 = arith.constant 0 : i32
    %c0_i32_0 = arith.constant 0 : i32
    %c0_i32_1 = arith.constant 0 : i32
    return %arg0, %c0_i32, %c0_i32_0 : i32, i32, i32
  }
}

</mosaic_0001>

<bundles_post_ra>
// kernel: _up_forward_impl.1
= control target key start
LH: loop header
LB: loop body
LE: loop exit
PB: predicated region body
PF: predicated region fallthrough
CT: control target
= control target key end

     0   :  { %vm73_vm0 = vcmask 523264   ;;  %s2381_s22 = smov 16   ;;  %s2382_s23 = smov 1   ;;  %v206_v40 = vlaneseq  ;;  %vm245_vm2 = vcmask 64512   ;;  %vm1214_vm10 = vcmask 1043456   ;;  %s3167_s2 = inlined_call_operand.vmem [shape: f32[64,256], index: 2, kind: input, shape index: {}]   ;;  %s3168_s0 = inlined_call_operand.vmem [shape: f32[1,2,4,64], index: 0, kind: input, shape index: {}]   ;;  %s3169_s1 = inlined_call_operand.vmem [shape: f32[1,4,512], index: 1, kind: input, shape index: {}]   ;;  %s3170_s3 = inlined_call_operand.vmem [shape: f32[9,512], index: 3, kind: input, shape index: {}]   ;;  %s3171_s4 = inlined_call_operand.vmem [shape: f32[9,4,8], index: 4, kind: input, shape index: {}]   ;;  %s3172_s5 = inlined_call_operand.vmem [shape: f32[4,1], index: 5, kind: input, shape index: {}]   ;;  %s3173_s7 = inlined_call_operand.vmem [shape: f32[4,1], index: 7, kind: input, shape index: {}]   ;;  %s3174_s6 = inlined_call_operand.vmem [shape: f32[9,4,4], index: 6, kind: input, shape index: {}]   ;;  %s3175_s8 = inlined_call_operand.vmem [shape: f32[1,4,512], index: 8, kind: output, shape index: {}]  }
   0x1   :  { %v72_v0 = vld [vmem:[%s3167_s2 + $0x78] sm:$0xff]  ;;  %v70_v1 = vld [vmem:[%s3167_s2 + $0x68] sm:$0xff]  ;;  %v141_v2 = vld [vmem:[%s3167_s2 + $0x70] sm:$0xff]  ;;  %s2383_s24 = smov 113   ;;  %s2384_s25 = smov 127   ;;  %vm1210_vm11 = vcmask 31744  }
   0x2   :  { %105 = vmatpush.msra.mxu1 %v72_v0  ;;  %154 = vmatpush.msra.mxu2 %v141_v2  ;;  %v139_v3 = vld [vmem:[%s3167_s2 + $0x60] sm:$0xff]  ;;  %v68_v4 = vld [vmem:[%s3167_s2 + $0x58] sm:$0xff]  ;;  %v137_v5 = vld [vmem:[%s3167_s2 + $0x50] sm:$0xff]  ;;  %s2385_s26 = smov 112   ;;  %s2386_s27 = smov 111   ;;  %v2572_v43 = vand.u32 127, %v206_v40 }
   0x3   :  { %174 = vmatpush.msra.mxu3 %v72_v0  ;;  %85 = vmatpush.msra.mxu0 %v141_v2  ;;  %v66_v6 = vld [vmem:[%s3167_s2 + $0x48] sm:$0xff]  ;;  %v135_v7 = vld [vmem:[%s3167_s2 + $0x40] sm:$0xff]  ;;  %v64_v8 = vld [vmem:[%s3167_s2 + $0x38] sm:$0xff] }
   0x4   :  { %106 = vmatpush.msra.mxu1 %v70_v1  ;;  %155 = vmatpush.msra.mxu2 %v139_v3  ;;  %v133_v9 = vld [vmem:[%s3167_s2 + $0x30] sm:$0xff]  ;;  %v62_v10 = vld [vmem:[%s3167_s2 + $0x28] sm:$0xff]  ;;  %v131_v11 = vld [vmem:[%s3167_s2 + $0x20] sm:$0xff]  ;;  %vm230_vm1 = vcmp.lt.s32.totalorder %v2572_v43, 16  ;;  %vm208_vm3 = vcmp.lt.s32.totalorder %v2572_v43, 17  ;;  %vm420_vm4 = vcmp.lt.s32.totalorder %v2572_v43, 15 }
   0x5   :  { %175 = vmatpush.msra.mxu3 %v70_v1  ;;  %86 = vmatpush.msra.mxu0 %v139_v3  ;;  %v60_v12 = vld [vmem:[%s3167_s2 + $0x18] sm:$0xff]  ;;  %v129_v13 = vld [vmem:[%s3167_s2 + $0x10] sm:$0xff]  ;;  %v58_v14 = vld [vmem:[%s3167_s2 + $0x8] sm:$0xff]  ;;  %vm530_vm5 = vcmp.lt.s32.totalorder %v2572_v43, 1  ;;  %vm729_vm6 = vcmp.lt.s32.totalorder %v2572_v43, 127  ;;  %vm839_vm7 = vcmp.lt.s32.totalorder %v2572_v43, 113 }
   0x6   :  { %107 = vmatpush.msra.mxu1 %v68_v4  ;;  %156 = vmatpush.msra.mxu2 %v137_v5  ;;  %v127_v15 = vld [vmem:[%s3167_s2] sm:$0xff]  ;;  %v38_v20 = vld [vmem:[%s3169_s1 + $0x8] sm:$0xff]  ;;  %v2596_v55 = vld [vmem:[%s3170_s3 + $0x18] sm:$0xff]  ;;  %vm949_vm8 = vcmp.lt.s32.totalorder %v2572_v43, 112  ;;  %vm1059_vm9 = vcmp.lt.s32.totalorder %v2572_v43, 111 }
   0x7   :  { %176 = vmatpush.msra.mxu3 %v68_v4  ;;  %87 = vmatpush.msra.mxu0 %v137_v5  ;;  %v56_v16 = vld [vmem:[%s3168_s0] sm:$0xf]  ;;  %v2237_v17 = vld [vmem:[%s3168_s0 + $0x4] sm:$0xf]  ;;  %43 = vst [vmem:[#allocation1 + $0x10] ss:$2 sm:$0xff] %v38_v20 }
   0x8   :  { %108 = vmatpush.msra.mxu1 %v66_v6  ;;  %157 = vmatpush.msra.mxu2 %v135_v7  ;;  %v37_v18 = vld [vmem:[%s3169_s1] sm:$0xff]  ;;  %s2379_s0 = smov 15   ;;  %s2380_s1 = smov 17   ;;  %v2577_v44 = vld [vmem:[%s3170_s3 + $0x8] sm:$0xff]  ;;  %v2601_v56 = vld [vmem:[%s3170_s3 + $0x10] sm:$0xff]  ;;  %v238_v60 = vperm.slane %v2596_v55, 1 }
   0x9   :  { %177 = vmatpush.msra.mxu3 %v66_v6  ;;  %88 = vmatpush.msra.mxu0 %v135_v7  ;;  %41 = vst [vmem:[#allocation1] ss:$2 sm:$0xff] %v37_v18  ;;  %v2570_v42 = vld [vmem:[%s3170_s3] sm:$0xff]  ;;  %v236_v46 = vperm.slane %v2577_v44, 1  ;;  %v214_v58 = vperm.slane %v2577_v44, 0  ;;  %v237_v59 = vperm.slane %v2601_v56, 1 }
   0xa   :  { %109 = vmatpush.msra.mxu1 %v64_v8  ;;  %158 = vmatpush.msra.mxu2 %v133_v9  ;;  %v235_v45 = vperm.slane %v2570_v42, 1  ;;  %v2240_v54 = vld [vmem:[%s3171_s4 + $0x4] sm:$0xf]  ;;  %v213_v57 = vperm.slane %v2570_v42, 0  ;;  %v216_v61 = vperm.slane %v2596_v55, 0  ;;  %v215_v62 = vperm.slane %v2601_v56, 0 }
   0xb   :  { %178 = vmatpush.msra.mxu3 %v64_v8  ;;  %89 = vmatpush.msra.mxu0 %v133_v9  ;;  %v426_v1 = vperm.slane %v2577_v44, 2  ;;  %v3193_v18 = vperm.slane %v2570_v42, 2 }
   0xc   :  { %110 = vmatpush.msra.mxu1 %v62_v10  ;;  %159 = vmatpush.msra.mxu2 %v131_v11 }
   0xd   :  { %179 = vmatpush.msra.mxu3 %v62_v10  ;;  %90 = vmatpush.msra.mxu0 %v131_v11 }
   0xe   :  { %111 = vmatpush.msra.mxu1 %v60_v12  ;;  %160 = vmatpush.msra.mxu2 %v129_v13  ;;  %v46_v21 = vld.sshfl [vmem:[#allocation1 + $0x10] sm:$0xff pattern:$0x75316420]  ;;  %v47_v22 = vld.sshfl [vmem:[#allocation1 + $0x18] sm:$0xff pattern:$0x75316420] }
   0xf   :  { %180 = vmatpush.msra.mxu3 %v60_v12  ;;  %91 = vmatpush.msra.mxu0 %v129_v13  ;;  %54 = vst [vmem:[#allocation2 + $0x18] sm:$0xf] %v46_v21 }
  0x10   :  { %112 = vmatpush.msra.mxu1 %v58_v14  ;;  %161 = vmatpush.msra.mxu2 %v127_v15  ;;  %v45_v19 = vld.sshfl [vmem:[#allocation1 + $0x8] sm:$0xff pattern:$0x75316420]  ;;  %v44_v23 = vld.sshfl [vmem:[#allocation1] sm:$0xff pattern:$0x75316420] }
  0x11   :  { %2236 = vmatmul.msk.f32.vlgmr.msra.gmra.mxu1 %vm73_vm0, %v56_v16  ;;  %181 = vmatpush.msra.mxu3 %v58_v14  ;;  %53 = vst [vmem:[#allocation2] sm:$0xf] %v45_v19  ;;  %v221_v14 = vld [vmem:[%s3171_s4] sm:$0xf] }
  0x12   :  { %2238 = vmatmul.msk.f32.vlgmr.msra.gmra.mxu2 %vm73_vm0, %v2237_v17  ;;  %2239 = vmatmul.msk.f32.vlgmr.msra.gmra.mxu3 %vm73_vm0, %v2237_v17  ;;  %55 = vst [vmem:[#allocation2 + $0x8] sm:$0xf] %v47_v22 }
  0x13   :  { %92 = vmatpush.msra.mxu0 %v127_v15  ;;  %52 = vst [vmem:[#allocation2 + $0x10] sm:$0xf] %v44_v23 }
  0x14   :  { %2235 = vmatmul.msk.f32.vlgmr.msra.gmra.mxu0 %vm73_vm0, %v56_v16 }
  0x8e   :  { %v114_v24 = vpop.f32.mrf.mxu1 }
  0x8f   :  { %v120_v25 = vrot.slane %v114_v24, 4  ;;  %v2249_v24 = vld [vmem:[%s3171_s4 + $0x8] sm:$0xf] }
  0x91   :  { %124 = vst [vmem:[#allocation2] sm:$0xf0] %v120_v25  ;;  %v94_v26 = vpop.f32.mrf.mxu0  ;;  %v3190_v25 = vperm.slane %v2596_v55, 3 }
  0x92   :  { %v119_v27 = vrot.slane %v94_v26, 4  ;;  %v3192_v26 = vperm.slane %v2596_v55, 2 }
  0x94   :  { %123 = vst [vmem:[#allocation2 + $0x10] sm:$0xf0] %v119_v27  ;;  %v3191_v27 = vperm.slane %v2601_v56, 3 }
  0x95   :  { %v163_v28 = vpop.f32.mrf.mxu2  ;;  %v183_v29 = vpop.f32.mrf.mxu3 }
  0x96   :  { %v188_v30 = vrot.slane %v163_v28, 4  ;;  %v189_v31 = vrot.slane %v183_v29, 4  ;;  %v3194_v29 = vperm.slane %v2601_v56, 2 }
  0x98   :  { %192 = vst [vmem:[#allocation2 + $0x18] sm:$0xf0] %v188_v30  ;;  %v2493_v32 = vld [vmem:[#allocation2] sm:$0xff] }
  0x99   :  { %193 = vst [vmem:[#allocation2 + $0x8] sm:$0xf0] %v189_v31  ;;  %414 = vrot.lane.b32.xlu2 %v2493_v32, %s2379_s0  ;;  %200 = vrot.lane.b32.xlu1 %v2493_v32, %s2380_s1 }
  0x9a   :  { %224 = vrot.lane.b32.xlu0 %v2493_v32, %s2381_s22 }
  0x9b   :  { %v2503_v34 = vld [vmem:[#allocation2 + $0x10] sm:$0xff] }
  0x9f   :  { %v2501_v33 = vld [vmem:[#allocation2 + $0x18] sm:$0xff] }
  0xa0   :  { %v2505_v35 = vld [vmem:[#allocation2 + $0x8] sm:$0xff] }
  0xa1   :  { %202 = vrot.lane.b32.xlu2 %v2501_v33, %s2380_s1  ;;  %228 = vrot.lane.b32.xlu1 %v2505_v35, %s2381_s22 }
  0xa2   :  { %222 = vrot.lane.b32.xlu0 %v2503_v34, %s2381_s22 }
  0xa9   :  { %204 = vrot.lane.b32.xlu2 %v2505_v35, %s2380_s1  ;;  %198 = vrot.lane.b32.xlu1 %v2503_v34, %s2380_s1 }
  0xaa   :  { %226 = vrot.lane.b32.xlu0 %v2501_v33, %s2381_s22 }
  0xb1   :  { %412 = vrot.lane.b32.xlu2 %v2503_v34, %s2379_s0  ;;  %418 = vrot.lane.b32.xlu1 %v2505_v35, %s2379_s0 }
  0xb2   :  { %524 = vrot.lane.b32.xlu0 %v2493_v32, %s2382_s23 }
  0xb9   :  { %528 = vrot.lane.b32.xlu2 %v2505_v35, %s2382_s23  ;;  %526 = vrot.lane.b32.xlu1 %v2501_v33, %s2382_s23 }
  0xba   :  { %416 = vrot.lane.b32.xlu0 %v2501_v33, %s2379_s0 }
  0xc1   :  { %831 = vrot.lane.b32.xlu2 %v2503_v34, %s2383_s24  ;;  %721 = vrot.lane.b32.xlu1 %v2503_v34, %s2384_s25 }
  0xc2   :  { %522 = vrot.lane.b32.xlu0 %v2503_v34, %s2382_s23 }
  0xc9   :  { %725 = vrot.lane.b32.xlu2 %v2501_v33, %s2384_s25  ;;  %723 = vrot.lane.b32.xlu1 %v2493_v32, %s2384_s25 }
  0xca   :  { %941 = vrot.lane.b32.xlu0 %v2503_v34, %s2385_s26 }
  0xd1   :  { %833 = vrot.lane.b32.xlu2 %v2493_v32, %s2383_s24  ;;  %837 = vrot.lane.b32.xlu1 %v2505_v35, %s2383_s24 }
  0xd2   :  { %727 = vrot.lane.b32.xlu0 %v2505_v35, %s2384_s25 }
  0xd9   :  { %947 = vrot.lane.b32.xlu2 %v2505_v35, %s2385_s26  ;;  %945 = vrot.lane.b32.xlu1 %v2501_v33, %s2385_s26 }
  0xda   :  { %835 = vrot.lane.b32.xlu0 %v2501_v33, %s2383_s24 }
  0xe1   :  { %1055 = vrot.lane.b32.xlu2 %v2501_v33, %s2386_s27  ;;  %1051 = vrot.lane.b32.xlu1 %v2503_v34, %s2386_s27 }
  0xe2   :  { %943 = vrot.lane.b32.xlu0 %v2493_v32, %s2385_s26 }
  0xe9   :  { %1053 = vrot.lane.b32.xlu1 %v2493_v32, %s2386_s27 }
  0xea   :  { %1057 = vrot.lane.b32.xlu0 %v2505_v35, %s2386_s27 }
  0xf3   :  { %v2565_v36 = vpop.permute.xlu2 %414 }
  0xfb   :  { %v203_v37 = vpop.permute.xlu2 %202 }
 0x103   :  { %v205_v38 = vpop.permute.xlu2 %204 }
 0x104   :  { %v209_v10 = vsel %vm208_vm3, %v203_v37, %v205_v38 }
 0x105   :  { %v220_v16 = vmul.f32 %v216_v61, %v209_v10 }
 0x10b   :  { %v201_v39 = vpop.permute.xlu1 %200  ;;  %v413_v47 = vpop.permute.xlu2 %412 }
 0x10c   :  { %v225_v41 = vpop.permute.xlu0 %224  ;;  %v210_v0 = vsel %vm208_vm3, %v201_v39, %v203_v37  ;;  %v423_v11 = vsel %vm420_vm4, %v413_v47, %v2565_v36 }
 0x10d   :  { %v219_v15 = vmul.f32 %v215_v62, %v210_v0  ;;  %v430_v17 = vmul.f32 %v426_v1, %v423_v11 }
 0x113   :  { %v229_v48 = vpop.permute.xlu1 %228  ;;  %v2620_v5 = vpop.permute.xlu2 %528 }
 0x114   :  { %v223_v49 = vpop.permute.xlu0 %222 }
 0x115   :  { %v233_v50 = vsel %vm230_vm1, %v223_v49, %v225_v41  ;;  %v234_v51 = vsel %vm230_vm1, %v229_v48, %v223_v49 }
 0x116   :  { %v239_v52 = vmul.f32 %v235_v45, %v234_v51  ;;  %v240_v53 = vmul.f32 %v236_v46, %v233_v50  ;;  %v3188_v50 = vperm.slane %v2570_v42, 3 }
 0x118   :  { %264 = vmatpush.msrb.mxu0 %v239_v52  ;;  %284 = vmatpush.msrb.mxu1 %v240_v53 }
 0x119   :  { %2241 = vmatmul.msk.f32.vlgmr.msrb.gmra.mxu0 %vm245_vm2, %v2240_v54  ;;  %2242 = vmatmul.msk.f32.vlgmr.msrb.gmra.mxu1 %vm245_vm2, %v2240_v54 }
 0x11b   :  { %v199_v63 = vpop.permute.xlu1 %198  ;;  %v2657_v23 = vpop.permute.xlu2 %831 }
 0x11c   :  { %v211_v2 = vsel %vm208_vm3, %v199_v63, %v201_v39  ;;  %v212_v3 = vsel %vm208_vm3, %v205_v38, %v199_v63  ;;  %v227_v4 = vpop.permute.xlu0 %226 }
 0x11d   :  { %v217_v6 = vmul.f32 %v213_v57, %v212_v3  ;;  %v218_v7 = vmul.f32 %v214_v58, %v211_v2  ;;  %v231_v8 = vsel %vm230_vm1, %v227_v4, %v229_v48  ;;  %v232_v9 = vsel %vm230_vm1, %v225_v41, %v227_v4 }
 0x11e   :  { %v241_v12 = vmul.f32 %v237_v59, %v232_v9  ;;  %v242_v13 = vmul.f32 %v238_v60, %v231_v8  ;;  %v3185_v2 = vperm.slane %v2577_v44, 5  ;;  %v3183_v8 = vperm.slane %v2570_v42, 6 }
 0x11f   :  { %347 = vmatpush.msra.mxu0 %v217_v6  ;;  %367 = vmatpush.msra.mxu1 %v218_v7 }
 0x120   :  { %304 = vmatpush.msrb.mxu2 %v241_v12  ;;  %324 = vmatpush.msrb.mxu3 %v242_v13  ;;  %v3184_v12 = vperm.slane %v2601_v56, 5  ;;  %v3189_v13 = vperm.slane %v2596_v55, 5 }
 0x121   :  { %2243 = vmatmul.msk.f32.vlgmr.msrb.gmra.mxu2 %vm245_vm2, %v2240_v54  ;;  %2244 = vmatmul.msk.f32.vlgmr.msrb.gmra.mxu3 %vm245_vm2, %v2240_v54 }
 0x122   :  { %2245 = vmatmul.msk.f32.vlgmr.msra.gmra.mxu0 %vm245_vm2, %v221_v14  ;;  %387 = vmatpush.msra.mxu2 %v219_v15  ;;  %v3180_v15 = vperm.slane %v2596_v55, 6 }
 0x123   :  { %407 = vmatpush.msra.mxu3 %v220_v16  ;;  %473 = vmatpush.msrb.mxu1 %v430_v17  ;;  %v419_v19 = vpop.permute.xlu1 %418  ;;  %v726_v49 = vpop.permute.xlu2 %725  ;;  %v2387_v17 = vmov 0  }
 0x124   :  { %v424_v20 = vsel %vm420_vm4, %v419_v19, %v413_v47  ;;  %v525_v21 = vpop.permute.xlu0 %524  ;;  %2246 = vmatmul.msk.f32.vlgmr.msra.gmra.mxu1 %vm245_vm2, %v221_v14  ;;  %2373 = vset.pattern.permute.xlu2 %v2387_v17 }
 0x125   :  { %v429_v22 = vmul.f32 %v3193_v18, %v424_v20  ;;  %2374 = vset.pattern.permute.xlu0 %v2387_v17  ;;  %v2832_v17 = vld [vmem:[%s3170_s3 + $0x38] ss:$0 sm:$0xff] }
 0x127   :  { %453 = vmatpush.msrb.mxu0 %v429_v22 }
 0x129   :  { %2247 = vmatmul.msk.f32.vlgmr.msra.gmra.mxu2 %vm245_vm2, %v221_v14  ;;  %2248 = vmatmul.msk.f32.vlgmr.msra.gmra.mxu3 %vm245_vm2, %v221_v14  ;;  %v1161_v14 = vld [vmem:[%s3172_s5] sm:$0xf] }
 0x12a   :  { %2250 = vmatmul.msk.f32.vlgmr.msrb.gmra.mxu0 %vm245_vm2, %v2249_v24  ;;  %1164 = vperm.xlu2 %2373, %v1161_v14   ;;  %v2820_v14 = vld [vmem:[%s3170_s3 + $0x28] ss:$0 sm:$0xff] }
 0x12b   :  { %v527_v28 = vpop.permute.xlu1 %526  ;;  %v834_v3 = vpop.permute.xlu2 %833 }
 0x12c   :  { %v531_v30 = vsel %vm530_vm5, %v527_v28, %v2620_v5  ;;  %v532_v31 = vsel %vm530_vm5, %v525_v21, %v527_v28  ;;  %v417_v37 = vpop.permute.xlu0 %416  ;;  %2251 = vmatmul.msk.f32.vlgmr.msrb.gmra.mxu1 %vm245_vm2, %v2249_v24  ;;  %v3178_v28 = vperm.slane %v2596_v55, 7 }
 0x12d   :  { %v421_v38 = vsel %vm420_vm4, %v417_v37, %v419_v19  ;;  %v542_v39 = vmul.f32 %v3190_v25, %v531_v30  ;;  %v422_v40 = vsel %vm420_vm4, %v2565_v36, %v417_v37  ;;  %v541_v47 = vmul.f32 %v3191_v27, %v532_v31 }
 0x12e   :  { %v432_v41 = vmul.f32 %v3192_v26, %v421_v38  ;;  %v431_v48 = vmul.f32 %v3194_v29, %v422_v40  ;;  %v3187_v36 = vperm.slane %v2577_v44, 3  ;;  %v3182_v40 = vperm.slane %v2577_v44, 6 }
 0x130   :  { %513 = vmatpush.msrb.mxu3 %v432_v41  ;;  %493 = vmatpush.msrb.mxu2 %v431_v48  ;;  %v3181_v41 = vperm.slane %v2601_v56, 6 }
 0x131   :  { %2253 = vmatmul.msk.f32.vlgmr.msrb.gmra.mxu3 %vm245_vm2, %v2249_v24  ;;  %2252 = vmatmul.msk.f32.vlgmr.msrb.gmra.mxu2 %vm245_vm2, %v2249_v24 }
 0x132   :  { %623 = vmatpush.msra.mxu3 %v542_v39  ;;  %603 = vmatpush.msra.mxu2 %v541_v47  ;;  %v3179_v47 = vperm.slane %v2601_v56, 7 }
 0x133   :  { %v722_v51 = vpop.permute.xlu1 %721  ;;  %v948_v24 = vpop.permute.xlu2 %947 }
 0x134   :  { %712 = vmatpush.msrb.mxu3 %v2505_v35  ;;  %692 = vmatpush.msrb.mxu2 %v2501_v33  ;;  %v523_v52 = vpop.permute.xlu0 %522  ;;  %v2254_v35 = vld [vmem:[%s3171_s4 + $0xc] sm:$0xf]  ;;  %v3186_v33 = vperm.slane %v2570_v42, 5 }
 0x135   :  { %v533_v53 = vsel %vm530_vm5, %v523_v52, %v525_v21  ;;  %v534_v54 = vsel %vm530_vm5, %v2620_v5, %v523_v52 }
 0x136   :  { %v539_v63 = vmul.f32 %v3188_v50, %v534_v54  ;;  %v540_v0 = vmul.f32 %v3187_v36, %v533_v53 }
 0x138   :  { %563 = vmatpush.msra.mxu0 %v539_v63  ;;  %583 = vmatpush.msra.mxu1 %v540_v0  ;;  %v2269_v0 = vld [vmem:[%s3171_s4 + $0x18] sm:$0xf] }
 0x139   :  { %2255 = vmatmul.msk.f32.vlgmr.msra.gmra.mxu0 %vm245_vm2, %v2254_v35  ;;  %2256 = vmatmul.msk.f32.vlgmr.msra.gmra.mxu1 %vm245_vm2, %v2254_v35 }
 0x13a   :  { %2257 = vmatmul.msk.f32.vlgmr.msra.gmra.mxu2 %vm245_vm2, %v2254_v35  ;;  %2258 = vmatmul.msk.f32.vlgmr.msra.gmra.mxu3 %vm245_vm2, %v2254_v35 }
 0x13b   :  { %652 = vmatpush.msrb.mxu0 %v2503_v34  ;;  %672 = vmatpush.msrb.mxu1 %v2493_v32  ;;  %v724_v4 = vpop.permute.xlu1 %723  ;;  %v842_v32 = vsel %vm839_vm7, %v2657_v23, %v834_v3  ;;  %v2259_v34 = vld [vmem:[%s3171_s4 + $0x10] sm:$0xf] }
 0x13c   :  { %v731_v5 = vsel %vm729_vm6, %v724_v4, %v726_v49  ;;  %v732_v6 = vsel %vm729_vm6, %v722_v51, %v724_v4  ;;  %v2721_v7 = vpop.permute.xlu0 %941  ;;  %v848_v11 = vmul.f32 %v3183_v8, %v842_v32  ;;  %v3176_v4 = vperm.slane %v2577_v44, 7 }
 0x13d   :  { %v738_v9 = vmul.f32 %v3186_v33, %v732_v6  ;;  %v739_v10 = vmul.f32 %v3185_v2, %v731_v5  ;;  %v953_v37 = vsel %vm949_vm8, %v948_v24, %v2721_v7 }
 0x13e   :  { %v961_v39 = vmul.f32 %v3178_v28, %v953_v37 }
 0x13f   :  { %762 = vmatpush.msra.mxu0 %v738_v9  ;;  %782 = vmatpush.msra.mxu1 %v739_v10 }
 0x141   :  { %2260 = vmatmul.msk.f32.vlgmr.msrb.gmra.mxu0 %vm245_vm2, %v2259_v34  ;;  %2261 = vmatmul.msk.f32.vlgmr.msrb.gmra.mxu1 %vm245_vm2, %v2259_v34 }
 0x142   :  { %2262 = vmatmul.msk.f32.vlgmr.msrb.gmra.mxu2 %vm245_vm2, %v2259_v34  ;;  %2263 = vmatmul.msk.f32.vlgmr.msrb.gmra.mxu3 %vm245_vm2, %v2259_v34 }
 0x143   :  { %872 = vmatpush.msrb.mxu0 %v848_v11  ;;  %v838_v16 = vpop.permute.xlu1 %837  ;;  %v2274_v11 = vld [vmem:[%s3171_s4 + $0x1c] sm:$0xf] }
 0x144   :  { %v843_v19 = vsel %vm839_vm7, %v838_v16, %v2657_v23  ;;  %v728_v20 = vpop.permute.xlu0 %727  ;;  %v2264_v23 = vld [vmem:[%s3171_s4 + $0x14] sm:$0xf] }
 0x145   :  { %v730_v21 = vsel %vm729_vm6, %v726_v49, %v728_v20  ;;  %v733_v22 = vsel %vm729_vm6, %v728_v20, %v722_v51  ;;  %v851_v38 = vmul.f32 %v3180_v15, %v843_v19  ;;  %v1056_v19 = vpop.permute.xlu2 %1055 }
 0x146   :  { %v740_v30 = vmul.f32 %v3184_v12, %v730_v21  ;;  %v741_v31 = vmul.f32 %v3189_v13, %v733_v22 }
 0x148   :  { %802 = vmatpush.msra.mxu2 %v740_v30  ;;  %822 = vmatpush.msra.mxu3 %v741_v31 }
 0x149   :  { %2265 = vmatmul.msk.f32.vlgmr.msra.gmra.mxu0 %vm245_vm2, %v2264_v23  ;;  %2266 = vmatmul.msk.f32.vlgmr.msra.gmra.mxu1 %vm245_vm2, %v2264_v23 }
 0x14a   :  { %2267 = vmatmul.msk.f32.vlgmr.msra.gmra.mxu2 %vm245_vm2, %v2264_v23  ;;  %2268 = vmatmul.msk.f32.vlgmr.msra.gmra.mxu3 %vm245_vm2, %v2264_v23 }
 0x14b   :  { %932 = vmatpush.msrb.mxu3 %v851_v38  ;;  %v946_v48 = vpop.permute.xlu1 %945 }
 0x14c   :  { %v950_v49 = vsel %vm949_vm8, %v946_v48, %v948_v24  ;;  %v836_v51 = vpop.permute.xlu0 %835 }
 0x14d   :  { %1042 = vmatpush.msra.mxu3 %v961_v39  ;;  %v840_v52 = vsel %vm839_vm7, %v836_v51, %v838_v16  ;;  %v841_v53 = vsel %vm839_vm7, %v834_v3, %v836_v51  ;;  %v960_v35 = vmul.f32 %v3179_v47, %v950_v49  ;;  %v3177_v3 = vperm.slane %v2570_v42, 7  ;;  %v2827_v16 = vld [vmem:[%s3170_s3 + $0x30] ss:$0 sm:$0xff] }
 0x14e   :  { %v849_v54 = vmul.f32 %v3182_v40, %v841_v53  ;;  %v850_v63 = vmul.f32 %v3181_v41, %v840_v52 }
 0x150   :  { %892 = vmatpush.msrb.mxu1 %v849_v54  ;;  %912 = vmatpush.msrb.mxu2 %v850_v63 }
 0x151   :  { %2270 = vmatmul.msk.f32.vlgmr.msrb.gmra.mxu0 %vm245_vm2, %v2269_v0  ;;  %2271 = vmatmul.msk.f32.vlgmr.msrb.gmra.mxu1 %vm245_vm2, %v2269_v0 }
 0x152   :  { %2272 = vmatmul.msk.f32.vlgmr.msrb.gmra.mxu2 %vm245_vm2, %v2269_v0  ;;  %2273 = vmatmul.msk.f32.vlgmr.msrb.gmra.mxu3 %vm245_vm2, %v2269_v0 }
 0x153   :  { %1022 = vmatpush.msra.mxu2 %v960_v35  ;;  %v1052_v5 = vpop.permute.xlu1 %1051 }
 0x154   :  { %v944_v6 = vpop.permute.xlu0 %943 }
 0x155   :  { %v951_v9 = vsel %vm949_vm8, %v944_v6, %v946_v48  ;;  %v952_v10 = vsel %vm949_vm8, %v2721_v7, %v944_v6  ;;  %v2815_v7 = vld [vmem:[%s3170_s3 + $0x20] ss:$0 sm:$0xff] }
 0x156   :  { %v958_v32 = vmul.f32 %v3177_v3, %v952_v10  ;;  %v959_v34 = vmul.f32 %v3176_v4, %v951_v9  ;;  %v2279_v48 = vld [vmem:[%s3171_s4 + $0x20] sm:$0xf] }
 0x158   :  { %982 = vmatpush.msra.mxu0 %v958_v32  ;;  %1002 = vmatpush.msra.mxu1 %v959_v34 }
 0x159   :  { %2275 = vmatmul.msk.f32.vlgmr.msra.gmra.mxu0 %vm245_vm2, %v2274_v11  ;;  %2276 = vmatmul.msk.f32.vlgmr.msra.gmra.mxu1 %vm245_vm2, %v2274_v11 }
 0x15a   :  { %2277 = vmatmul.msk.f32.vlgmr.msra.gmra.mxu2 %vm245_vm2, %v2274_v11  ;;  %2278 = vmatmul.msk.f32.vlgmr.msra.gmra.mxu3 %vm245_vm2, %v2274_v11 }
 0x15b   :  { %v1054_v20 = vpop.permute.xlu1 %1053 }
 0x15c   :  { %v1061_v21 = vsel %vm1059_vm9, %v1054_v20, %v1056_v19  ;;  %v1062_v22 = vsel %vm1059_vm9, %v1052_v5, %v1054_v20  ;;  %v1058_v24 = vpop.permute.xlu0 %1057 }
 0x15d   :  { %v1068_v30 = vmul.f32 %v2815_v7, %v1062_v22  ;;  %v1069_v31 = vmul.f32 %v2820_v14, %v1061_v21  ;;  %v1060_v23 = vsel %vm1059_vm9, %v1056_v19, %v1058_v24  ;;  %v1063_v37 = vsel %vm1059_vm9, %v1058_v24, %v1052_v5 }
 0x15e   :  { %v1070_v38 = vmul.f32 %v2827_v16, %v1060_v23  ;;  %v1071_v39 = vmul.f32 %v2832_v17, %v1063_v37 }
 0x15f   :  { %1092 = vmatpush.msrb.mxu0 %v1068_v30  ;;  %1112 = vmatpush.msrb.mxu1 %v1069_v31 }
 0x160   :  { %1132 = vmatpush.msrb.mxu2 %v1070_v38  ;;  %1152 = vmatpush.msrb.mxu3 %v1071_v39 }
 0x161   :  { %2280 = vmatmul.msk.f32.vlgmr.msrb.gmra.mxu0 %vm245_vm2, %v2279_v48  ;;  %2281 = vmatmul.msk.f32.vlgmr.msrb.gmra.mxu1 %vm245_vm2, %v2279_v48 }
 0x162   :  { %2282 = vmatmul.msk.f32.vlgmr.msrb.gmra.mxu2 %vm245_vm2, %v2279_v48  ;;  %2283 = vmatmul.msk.f32.vlgmr.msrb.gmra.mxu3 %vm245_vm2, %v2279_v48 }
 0x196   :  { %v286_v49 = vpop.f32.mrf.mxu1  ;;  %v266_v51 = vpop.f32.mrf.mxu0 }
 0x19f   :  { %v349_v53 = vpop.f32.mrf.mxu0 }
 0x1a0   :  { %v350_v4 = vadd.f32 %v349_v53, %v266_v51 }
 0x1a1   :  { %v369_v52 = vpop.f32.mrf.mxu1 }
 0x1a2   :  { %v370_v48 = vadd.f32 %v369_v52, %v286_v49 }
 0x1a4   :  { %v306_v54 = vpop.f32.mrf.mxu2  ;;  %v326_v63 = vpop.f32.mrf.mxu3 }
 0x1a7   :  { %v455_v6 = vpop.f32.mrf.mxu0 }
 0x1a8   :  { %v518_v3 = vadd.f32 %v455_v6, %v350_v4  ;;  %v1165_v4 = vpop.permute.xlu2 %1164 }
 0x1a9   :  { %v475_v0 = vpop.f32.mrf.mxu1 }
 0x1aa   :  { %v519_v28 = vadd.f32 %v475_v0, %v370_v48 }
 0x1ac   :  { %v389_v35 = vpop.f32.mrf.mxu2  ;;  %v409_v5 = vpop.f32.mrf.mxu3 }
 0x1ad   :  { %v390_v36 = vadd.f32 %v389_v35, %v306_v54  ;;  %v410_v50 = vadd.f32 %v409_v5, %v326_v63 }
 0x1b4   :  { %v515_v9 = vpop.f32.mrf.mxu3  ;;  %v495_v10 = vpop.f32.mrf.mxu2 }
 0x1b5   :  { %v520_v27 = vadd.f32 %v495_v10, %v390_v36  ;;  %v521_v26 = vadd.f32 %v515_v9, %v410_v50  ;;  %v2205_v10 = vld [vmem:[%s3173_s7] sm:$0xf] }
 0x1b6   :  { %v565_v32 = vpop.f32.mrf.mxu0  ;;  %v585_v34 = vpop.f32.mrf.mxu1 }
 0x1b7   :  { %v628_v47 = vadd.f32 %v565_v32, %v518_v3  ;;  %v629_v15 = vadd.f32 %v585_v34, %v519_v28 }
 0x1bd   :  { %v605_v11 = vpop.f32.mrf.mxu2  ;;  %v625_v19 = vpop.f32.mrf.mxu3 }
 0x1be   :  { %v654_v20 = vpop.f32.mrf.mxu0  ;;  %v674_v21 = vpop.f32.mrf.mxu1  ;;  %v630_v49 = vadd.f32 %v605_v11, %v520_v27  ;;  %v631_v51 = vadd.f32 %v625_v19, %v521_v26 }
 0x1bf   :  { %v717_v2 = vadd.f32 %v654_v20, %v628_v47  ;;  %v718_v33 = vadd.f32 %v674_v21, %v629_v15 }
 0x1c5   :  { %v694_v22 = vpop.f32.mrf.mxu2  ;;  %v714_v24 = vpop.f32.mrf.mxu3 }
 0x1c6   :  { %v764_v30 = vpop.f32.mrf.mxu0  ;;  %v784_v31 = vpop.f32.mrf.mxu1  ;;  %v719_v0 = vadd.f32 %v694_v22, %v630_v49  ;;  %v720_v6 = vadd.f32 %v714_v24, %v631_v51 }
 0x1c7   :  { %v827_v13 = vadd.f32 %v764_v30, %v717_v2  ;;  %v828_v25 = vadd.f32 %v784_v31, %v718_v33  ;;  %v2284_v30 = vld [vmem:[%s3174_s6 + $0x4] sm:$0xf] }
 0x1cd   :  { %v804_v23 = vpop.f32.mrf.mxu2  ;;  %v824_v37 = vpop.f32.mrf.mxu3 }
 0x1ce   :  { %v874_v38 = vpop.f32.mrf.mxu0  ;;  %v894_v39 = vpop.f32.mrf.mxu1  ;;  %v829_v63 = vadd.f32 %v804_v23, %v719_v0  ;;  %v830_v2 = vadd.f32 %v824_v37, %v720_v6 }
 0x1cf   :  { %v937_v18 = vadd.f32 %v874_v38, %v827_v13  ;;  %v938_v29 = vadd.f32 %v894_v39, %v828_v25 }
 0x1d5   :  { %v914_v41 = vpop.f32.mrf.mxu2  ;;  %v934_v40 = vpop.f32.mrf.mxu3 }
 0x1d6   :  { %v984_v8 = vpop.f32.mrf.mxu0  ;;  %v1004_v12 = vpop.f32.mrf.mxu1  ;;  %v939_v50 = vadd.f32 %v914_v41, %v829_v63  ;;  %v940_v13 = vadd.f32 %v934_v40, %v830_v2 }
 0x1d7   :  { %v1047_v52 = vadd.f32 %v984_v8, %v937_v18  ;;  %v1048_v3 = vadd.f32 %v1004_v12, %v938_v29 }
 0x1dd   :  { %v1024_v28 = vpop.f32.mrf.mxu2  ;;  %v1044_v53 = vpop.f32.mrf.mxu3 }
 0x1de   :  { %v1094_v32 = vpop.f32.mrf.mxu0  ;;  %v1114_v47 = vpop.f32.mrf.mxu1  ;;  %v1049_v18 = vadd.f32 %v1024_v28, %v939_v50  ;;  %v1050_v27 = vadd.f32 %v1044_v53, %v940_v13  ;;  %v3196_v50 = vperm.slane %v2570_v42, 2 }
 0x1df   :  { %v1157_v15 = vadd.f32 %v1094_v32, %v1047_v52  ;;  %v1158_v54 = vadd.f32 %v1114_v47, %v1048_v3  ;;  %v1191_v32 = vld [vmem:[%s3174_s6] sm:$0xf] }
 0x1e1   :  { %v1167_v33 = vadd.f32 %v1165_v4, %v1157_v15  ;;  %v1168_v36 = vadd.f32 %v1165_v4, %v1158_v54 }
 0x1e3   :  { %v2853_v25 = vmax.f32 %v1167_v33, 0.0  ;;  %v2855_v26 = vmax.f32 %v1168_v36, 0.0  ;;  %v3195_v33 = vperm.slane %v2601_v56, 2 }
 0x1e5   :  { %v1134_v29 = vpop.f32.mrf.mxu2  ;;  %v1154_v8 = vpop.f32.mrf.mxu3  ;;  %1175 = vrot.lane.b32.xlu1 %v2853_v25, %s2380_s1  ;;  %1192 = vrot.lane.b32.xlu0 %v2853_v25, %s2381_s22 }
 0x1e6   :  { %v1159_v12 = vadd.f32 %v1134_v29, %v1049_v18  ;;  %v1160_v35 = vadd.f32 %v1154_v8, %v1050_v27  ;;  %1194 = vrot.lane.b32.xlu2 %v2855_v26, %s2381_s22  ;;  %v3197_v18 = vperm.slane %v2596_v55, 2  ;;  %v2301_v29 = vld [vmem:[%s3174_s6 + $0x8] sm:$0xf] }
 0x1e8   :  { %v1169_v40 = vadd.f32 %v1165_v4, %v1159_v12  ;;  %v1170_v41 = vadd.f32 %v1165_v4, %v1160_v35 }
 0x1ea   :  { %v2863_v5 = vmax.f32 %v1169_v40, 0.0  ;;  %v2865_v9 = vmax.f32 %v1170_v41, 0.0  ;;  %v3198_v40 = vperm.slane %v2601_v56, 3 }
 0x1ed   :  { %1198 = vrot.lane.b32.xlu1 %v2865_v9, %s2381_s22  ;;  %1196 = vrot.lane.b32.xlu0 %v2863_v5, %s2381_s22 }
 0x1ee   :  { %1402 = vrot.lane.b32.xlu2 %v2853_v25, %s2379_s0 }
 0x1f5   :  { %1179 = vrot.lane.b32.xlu1 %v2863_v5, %s2380_s1  ;;  %1177 = vrot.lane.b32.xlu0 %v2855_v26, %s2380_s1 }
 0x1f6   :  { %1181 = vrot.lane.b32.xlu2 %v2865_v9, %s2380_s1 }
 0x1fd   :  { %1404 = vrot.lane.b32.xlu1 %v2855_v26, %s2379_s0  ;;  %1408 = vrot.lane.b32.xlu0 %v2865_v9, %s2379_s0 }
 0x1fe   :  { %1406 = vrot.lane.b32.xlu2 %v2863_v5, %s2379_s0 }
 0x205   :  { %1525 = vrot.lane.b32.xlu1 %v2865_v9, %s2382_s23  ;;  %1523 = vrot.lane.b32.xlu0 %v2863_v5, %s2382_s23 }
 0x206   :  { %1521 = vrot.lane.b32.xlu2 %v2855_v26, %s2382_s23 }
 0x20d   :  { %1737 = vrot.lane.b32.xlu1 %v2853_v25, %s2384_s25  ;;  %1519 = vrot.lane.b32.xlu0 %v2853_v25, %s2382_s23 }
 0x20e   :  { %1854 = vrot.lane.b32.xlu2 %v2853_v25, %s2383_s24 }
 0x215   :  { %1739 = vrot.lane.b32.xlu1 %v2855_v26, %s2384_s25  ;;  %1741 = vrot.lane.b32.xlu0 %v2863_v5, %s2384_s25 }
 0x216   :  { %1743 = vrot.lane.b32.xlu2 %v2865_v9, %s2384_s25 }
 0x21d   :  { %1858 = vrot.lane.b32.xlu1 %v2863_v5, %s2383_s24  ;;  %1860 = vrot.lane.b32.xlu0 %v2865_v9, %s2383_s24 }
 0x21e   :  { %1856 = vrot.lane.b32.xlu2 %v2855_v26, %s2383_s24 }
 0x225   :  { %1977 = vrot.lane.b32.xlu1 %v2865_v9, %s2385_s26  ;;  %1971 = vrot.lane.b32.xlu0 %v2853_v25, %s2385_s26 }
 0x226   :  { %1975 = vrot.lane.b32.xlu2 %v2863_v5, %s2385_s26 }
 0x22d   :  { %2088 = vrot.lane.b32.xlu1 %v2853_v25, %s2386_s27  ;;  %1973 = vrot.lane.b32.xlu0 %v2855_v26, %s2385_s26 }
 0x22e   :  { %2094 = vrot.lane.b32.xlu2 %v2865_v9, %s2386_s27 }
 0x235   :  { %2090 = vrot.lane.b32.xlu1 %v2855_v26, %s2386_s27  ;;  %2092 = vrot.lane.b32.xlu0 %v2863_v5, %s2386_s27 }
 0x236   :  { %2208 = vperm.xlu2 %2373, %v2205_v10   ;;  %v3199_v10 = vperm.slane %v2596_v55, 3 }
 0x240   :  { %v1195_v34 = vpop.permute.xlu2 %1194 }
 0x248   :  { %v1403_v11 = vpop.permute.xlu2 %1402 }
 0x250   :  { %v1182_v19 = vpop.permute.xlu2 %1181 }
 0x257   :  { %v1176_v20 = vpop.permute.xlu1 %1175  ;;  %v1193_v21 = vpop.permute.xlu0 %1192 }
 0x258   :  { %v1202_v22 = vsel %vm230_vm1, %v1193_v21, %v1195_v34  ;;  %v1407_v31 = vpop.permute.xlu2 %1406  ;;  %v1186_v38 = vsel %vm208_vm3, %v1182_v19, %v1176_v20 }
 0x259   :  { %v1205_v24 = vmul.f32 %v1202_v22, %v236_v46  ;;  %v1187_v52 = vmul.f32 %v1186_v38, %v213_v57 }
 0x25b   :  { %2287 = vmatpush.msk.msra.mxu1 %vm1214_vm10, %v1205_v24 }
 0x25c   :  { %2288 = vmatmul.msk.f32.vlgmr.msra.gmra.mxu1 %vm1210_vm11, %v2284_v30 }
 0x25f   :  { %v1199_v23 = vpop.permute.xlu1 %1198  ;;  %v1197_v37 = vpop.permute.xlu0 %1196 }
 0x260   :  { %v1203_v39 = vsel %vm230_vm1, %v1199_v23, %v1193_v21  ;;  %v1200_v46 = vsel %vm230_vm1, %v1197_v37, %v1199_v23  ;;  %v1201_v48 = vsel %vm230_vm1, %v1195_v34, %v1197_v37  ;;  %v3202_v37 = vperm.slane %v2577_v44, 3 }
 0x261   :  { %v1204_v49 = vmul.f32 %v1203_v39, %v235_v45  ;;  %v1206_v51 = vmul.f32 %v1201_v48, %v237_v59  ;;  %v1207_v4 = vmul.f32 %v1200_v46, %v238_v60  ;;  %v1522_v45 = vpop.permute.xlu2 %1521  ;;  %v2319_v39 = vld [vmem:[%s3174_s6 + $0x10] sm:$0xf] }
 0x263   :  { %2285 = vmatpush.msk.msra.mxu0 %vm1214_vm10, %v1204_v49  ;;  %2289 = vmatpush.msk.msra.mxu2 %vm1214_vm10, %v1206_v51 }
 0x264   :  { %2291 = vmatpush.msk.msra.mxu3 %vm1214_vm10, %v1207_v4  ;;  %2290 = vmatmul.msk.f32.vlgmr.msra.gmra.mxu2 %vm1210_vm11, %v2284_v30 }
 0x265   :  { %2292 = vmatmul.msk.f32.vlgmr.msra.gmra.mxu3 %vm1210_vm11, %v2284_v30  ;;  %2293 = vmatpush.msk.msrb.mxu0 %vm1214_vm10, %v1187_v52 }
 0x266   :  { %2286 = vmatmul.msk.f32.vlgmr.msra.gmra.mxu0 %vm1210_vm11, %v2284_v30 }
 0x267   :  { %v1180_v59 = vpop.permute.xlu1 %1179  ;;  %v1178_v60 = vpop.permute.xlu0 %1177 }
 0x268   :  { %v1183_v57 = vsel %vm208_vm3, %v1180_v59, %v1182_v19  ;;  %v1184_v3 = vsel %vm208_vm3, %v1178_v60, %v1180_v59  ;;  %v1185_v28 = vsel %vm208_vm3, %v1176_v20, %v1178_v60  ;;  %v3204_v59 = vperm.slane %v2577_v44, 5 }
 0x269   :  { %v1190_v53 = vmul.f32 %v1183_v57, %v216_v61  ;;  %v1188_v0 = vmul.f32 %v1185_v28, %v214_v58  ;;  %v1189_v6 = vmul.f32 %v1184_v3, %v215_v62  ;;  %v2990_v63 = vpop.permute.xlu2 %1854  ;;  %v3205_v57 = vperm.slane %v2601_v56, 5 }
 0x26a   :  { %v3206_v28 = vperm.slane %v2570_v42, 6 }
 0x26b   :  { %2295 = vmatpush.msk.msrb.mxu1 %vm1214_vm10, %v1188_v0  ;;  %2297 = vmatpush.msk.msrb.mxu2 %vm1214_vm10, %v1189_v6  ;;  %v2328_v0 = vld [vmem:[%s3174_s6 + $0x14] sm:$0xf] }
 0x26c   :  { %2299 = vmatpush.msk.msrb.mxu3 %vm1214_vm10, %v1190_v53  ;;  %2298 = vmatmul.msk.f32.vlgmr.msrb.gmra.mxu2 %vm1210_vm11, %v1191_v32 }
 0x26d   :  { %2300 = vmatmul.msk.f32.vlgmr.msrb.gmra.mxu3 %vm1210_vm11, %v1191_v32  ;;  %2296 = vmatmul.msk.f32.vlgmr.msrb.gmra.mxu1 %vm1210_vm11, %v1191_v32 }
 0x26e   :  { %2294 = vmatmul.msk.f32.vlgmr.msrb.gmra.mxu0 %vm1210_vm11, %v1191_v32 }
 0x26f   :  { %v1405_v58 = vpop.permute.xlu1 %1404  ;;  %v1409_v61 = vpop.permute.xlu0 %1408 }
 0x270   :  { %v1411_v62 = vsel %vm420_vm4, %v1405_v58, %v1407_v31  ;;  %v1412_v47 = vsel %vm420_vm4, %v1403_v11, %v1405_v58  ;;  %v1410_v15 = vsel %vm420_vm4, %v1407_v31, %v1409_v61  ;;  %v1413_v54 = vsel %vm420_vm4, %v1409_v61, %v1403_v11  ;;  %v2310_v11 = vld [vmem:[%s3174_s6 + $0xc] sm:$0xf] }
 0x271   :  { %v1415_v2 = vmul.f32 %v1412_v47, %v426_v1  ;;  %v1416_v36 = vmul.f32 %v1411_v62, %v3195_v33  ;;  %v1414_v13 = vmul.f32 %v1413_v54, %v3196_v50  ;;  %v1417_v27 = vmul.f32 %v1410_v15, %v3197_v18  ;;  %v1744_v19 = vpop.permute.xlu2 %1743  ;;  %v2337_v50 = vld [vmem:[%s3174_s6 + $0x18] sm:$0xf] }
 0x272   :  { %v3207_v47 = vperm.slane %v2577_v44, 6  ;;  %v3208_v54 = vperm.slane %v2601_v56, 6  ;;  %v3209_v33 = vperm.slane %v2596_v55, 6 }
 0x273   :  { %2302 = vmatpush.msk.msra.mxu0 %vm1214_vm10, %v1414_v13  ;;  %2304 = vmatpush.msk.msra.mxu1 %vm1214_vm10, %v1415_v2 }
 0x274   :  { %2306 = vmatpush.msk.msra.mxu2 %vm1214_vm10, %v1416_v36  ;;  %2308 = vmatpush.msk.msra.mxu3 %vm1214_vm10, %v1417_v27 }
 0x275   :  { %2307 = vmatmul.msk.f32.vlgmr.msra.gmra.mxu2 %vm1210_vm11, %v2301_v29  ;;  %2309 = vmatmul.msk.f32.vlgmr.msra.gmra.mxu3 %vm1210_vm11, %v2301_v29 }
 0x276   :  { %2305 = vmatmul.msk.f32.vlgmr.msra.gmra.mxu1 %vm1210_vm11, %v2301_v29  ;;  %2303 = vmatmul.msk.f32.vlgmr.msra.gmra.mxu0 %vm1210_vm11, %v2301_v29 }
 0x277   :  { %v1526_v1 = vpop.permute.xlu1 %1525  ;;  %v1524_v8 = vpop.permute.xlu0 %1523 }
 0x278   :  { %v1527_v12 = vsel %vm530_vm5, %v1524_v8, %v1526_v1  ;;  %v1528_v35 = vsel %vm530_vm5, %v1522_v45, %v1524_v8 }
 0x279   :  { %v1533_v41 = vmul.f32 %v1528_v35, %v3198_v40  ;;  %v1534_v34 = vmul.f32 %v1527_v12, %v3199_v10  ;;  %v1857_v46 = vpop.permute.xlu2 %1856  ;;  %v3211_v12 = vperm.slane %v2596_v55, 7  ;;  %v2346_v40 = vld [vmem:[%s3174_s6 + $0x1c] sm:$0xf] }
 0x27a   :  { %v1864_v51 = vsel %vm839_vm7, %v2990_v63, %v1857_v46 }
 0x27b   :  { %2315 = vmatpush.msk.msrb.mxu2 %vm1214_vm10, %v1533_v41  ;;  %2317 = vmatpush.msk.msrb.mxu3 %vm1214_vm10, %v1534_v34  ;;  %v1866_v53 = vmul.f32 %v1864_v51, %v3206_v28 }
 0x27d   :  { %2324 = vmatpush.msk.msra.mxu2 %vm1214_vm10, %v2863_v5  ;;  %2326 = vmatpush.msk.msra.mxu3 %vm1214_vm10, %v2865_v9  ;;  %v3200_v5 = vperm.slane %v2596_v55, 5  ;;  %v3201_v9 = vperm.slane %v2570_v42, 3 }
 0x27e   :  { %2316 = vmatmul.msk.f32.vlgmr.msrb.gmra.mxu2 %vm1210_vm11, %v2310_v11  ;;  %2318 = vmatmul.msk.f32.vlgmr.msrb.gmra.mxu3 %vm1210_vm11, %v2310_v11 }
 0x27f   :  { %v1738_v20 = vpop.permute.xlu1 %1737  ;;  %v1520_v21 = vpop.permute.xlu0 %1519 }
 0x280   :  { %v1748_v22 = vsel %vm729_vm6, %v1744_v19, %v1738_v20  ;;  %v1529_v24 = vsel %vm530_vm5, %v1520_v21, %v1522_v45  ;;  %v1530_v30 = vsel %vm530_vm5, %v1526_v1, %v1520_v21  ;;  %v3210_v1 = vperm.slane %v2601_v56, 7 }
 0x281   :  { %v1752_v31 = vmul.f32 %v1748_v22, %v3200_v5  ;;  %v1531_v23 = vmul.f32 %v1530_v30, %v3201_v9  ;;  %v1532_v38 = vmul.f32 %v1529_v24, %v3202_v37  ;;  %v1976_v13 = vpop.permute.xlu2 %1975  ;;  %v3213_v22 = vperm.slane %v2577_v44, 7  ;;  %v2355_v30 = vld [vmem:[%s3174_s6 + $0x20] sm:$0xf] }
 0x283   :  { %2311 = vmatpush.msk.msrb.mxu0 %vm1214_vm10, %v1531_v23  ;;  %2313 = vmatpush.msk.msrb.mxu1 %vm1214_vm10, %v1532_v38 }
 0x284   :  { %2335 = vmatpush.msk.msrb.mxu3 %vm1214_vm10, %v1752_v31  ;;  %2312 = vmatmul.msk.f32.vlgmr.msrb.gmra.mxu0 %vm1210_vm11, %v2310_v11 }
 0x285   :  { %2314 = vmatmul.msk.f32.vlgmr.msrb.gmra.mxu1 %vm1210_vm11, %v2310_v11  ;;  %2320 = vmatpush.msk.msra.mxu0 %vm1214_vm10, %v2853_v25 }
 0x286   :  { %2322 = vmatpush.msk.msra.mxu1 %vm1214_vm10, %v2855_v26  ;;  %2325 = vmatmul.msk.f32.vlgmr.msra.gmra.mxu2 %vm1210_vm11, %v2319_v39  ;;  %v3203_v26 = vperm.slane %v2570_v42, 5 }
 0x287   :  { %2327 = vmatmul.msk.f32.vlgmr.msra.gmra.mxu3 %vm1210_vm11, %v2319_v39  ;;  %v1740_v48 = vpop.permute.xlu1 %1739  ;;  %v1742_v49 = vpop.permute.xlu0 %1741 }
 0x288   :  { %v1747_v4 = vsel %vm729_vm6, %v1738_v20, %v1740_v48  ;;  %v1745_v52 = vsel %vm729_vm6, %v1742_v49, %v1744_v19  ;;  %v1746_v25 = vsel %vm729_vm6, %v1740_v48, %v1742_v49  ;;  %v3212_v20 = vperm.slane %v2570_v42, 7 }
 0x289   :  { %v1749_v45 = vmul.f32 %v1747_v4, %v3203_v26  ;;  %v1750_v60 = vmul.f32 %v1746_v25, %v3204_v59  ;;  %v1751_v3 = vmul.f32 %v1745_v52, %v3205_v57  ;;  %v2095_v41 = vpop.permute.xlu2 %2094 }
 0x28b   :  { %2329 = vmatpush.msk.msrb.mxu0 %vm1214_vm10, %v1749_v45  ;;  %2331 = vmatpush.msk.msrb.mxu1 %vm1214_vm10, %v1750_v60 }
 0x28c   :  { %2333 = vmatpush.msk.msrb.mxu2 %vm1214_vm10, %v1751_v3  ;;  %2321 = vmatmul.msk.f32.vlgmr.msra.gmra.mxu0 %vm1210_vm11, %v2319_v39 }
 0x28d   :  { %2323 = vmatmul.msk.f32.vlgmr.msra.gmra.mxu1 %vm1210_vm11, %v2319_v39  ;;  %2338 = vmatpush.msk.msra.mxu0 %vm1214_vm10, %v1866_v53 }
 0x28e   :  { %2334 = vmatmul.msk.f32.vlgmr.msrb.gmra.mxu2 %vm1210_vm11, %v2328_v0 }
 0x28f   :  { %2336 = vmatmul.msk.f32.vlgmr.msrb.gmra.mxu3 %vm1210_vm11, %v2328_v0  ;;  %v1859_v6 = vpop.permute.xlu1 %1858  ;;  %v1861_v32 = vpop.permute.xlu0 %1860 }
 0x290   :  { %v1863_v58 = vsel %vm839_vm7, %v1857_v46, %v1859_v6  ;;  %v1862_v61 = vsel %vm839_vm7, %v1859_v6, %v1861_v32  ;;  %v1865_v62 = vsel %vm839_vm7, %v1861_v32, %v2990_v63 }
 0x291   :  { %v1867_v15 = vmul.f32 %v1863_v58, %v3207_v47  ;;  %v1868_v2 = vmul.f32 %v1862_v61, %v3208_v54  ;;  %v1869_v36 = vmul.f32 %v1865_v62, %v3209_v33 }
 0x293   :  { %2340 = vmatpush.msk.msra.mxu1 %vm1214_vm10, %v1867_v15  ;;  %2342 = vmatpush.msk.msra.mxu2 %vm1214_vm10, %v1868_v2 }
 0x294   :  { %2344 = vmatpush.msk.msra.mxu3 %vm1214_vm10, %v1869_v36  ;;  %2330 = vmatmul.msk.f32.vlgmr.msrb.gmra.mxu0 %vm1210_vm11, %v2328_v0 }
 0x295   :  { %2332 = vmatmul.msk.f32.vlgmr.msrb.gmra.mxu1 %vm1210_vm11, %v2328_v0 }
 0x296   :  { %2343 = vmatmul.msk.f32.vlgmr.msra.gmra.mxu2 %vm1210_vm11, %v2337_v50 }
 0x297   :  { %2345 = vmatmul.msk.f32.vlgmr.msra.gmra.mxu3 %vm1210_vm11, %v2337_v50  ;;  %v1978_v63 = vpop.permute.xlu1 %1977  ;;  %v1972_v18 = vpop.permute.xlu0 %1971 }
 0x298   :  { %v1979_v27 = vsel %vm949_vm8, %v1976_v13, %v1978_v63  ;;  %v1982_v29 = vsel %vm949_vm8, %v1978_v63, %v1972_v18 }
 0x299   :  { %v1985_v8 = vmul.f32 %v1979_v27, %v3210_v1  ;;  %v1986_v35 = vmul.f32 %v1982_v29, %v3211_v12 }
 0x29b   :  { %2351 = vmatpush.msk.msrb.mxu2 %vm1214_vm10, %v1985_v8  ;;  %2353 = vmatpush.msk.msrb.mxu3 %vm1214_vm10, %v1986_v35 }
 0x29c   :  { %2339 = vmatmul.msk.f32.vlgmr.msra.gmra.mxu0 %vm1210_vm11, %v2337_v50 }
 0x29d   :  { %2341 = vmatmul.msk.f32.vlgmr.msra.gmra.mxu1 %vm1210_vm11, %v2337_v50 }
 0x29e   :  { %2352 = vmatmul.msk.f32.vlgmr.msrb.gmra.mxu2 %vm1210_vm11, %v2346_v40 }
 0x29f   :  { %2354 = vmatmul.msk.f32.vlgmr.msrb.gmra.mxu3 %vm1210_vm11, %v2346_v40  ;;  %v2089_v56 = vpop.permute.xlu1 %2088  ;;  %v1974_v55 = vpop.permute.xlu0 %1973 }
 0x2a0   :  { %v2099_v10 = vsel %vm1059_vm9, %v2095_v41, %v2089_v56  ;;  %v1980_v34 = vsel %vm949_vm8, %v1974_v55, %v1976_v13  ;;  %v1981_v11 = vsel %vm949_vm8, %v1972_v18, %v1974_v55 }
 0x2a1   :  { %v2103_v19 = vmul.f32 %v2832_v17, %v2099_v10  ;;  %v1983_v21 = vmul.f32 %v1981_v11, %v3212_v20  ;;  %v1984_v24 = vmul.f32 %v1980_v34, %v3213_v22 }
 0x2a3   :  { %2347 = vmatpush.msk.msrb.mxu0 %vm1214_vm10, %v1983_v21  ;;  %2349 = vmatpush.msk.msrb.mxu1 %vm1214_vm10, %v1984_v24 }
 0x2a4   :  { %2362 = vmatpush.msk.msra.mxu3 %vm1214_vm10, %v2103_v19  ;;  %2348 = vmatmul.msk.f32.vlgmr.msrb.gmra.mxu0 %vm1210_vm11, %v2346_v40 }
 0x2a5   :  { %2350 = vmatmul.msk.f32.vlgmr.msrb.gmra.mxu1 %vm1210_vm11, %v2346_v40 }
 0x2a7   :  { %2363 = vmatmul.msk.f32.vlgmr.msra.gmra.mxu3 %vm1210_vm11, %v2355_v30  ;;  %v2091_v42 = vpop.permute.xlu1 %2090  ;;  %v2093_v17 = vpop.permute.xlu0 %2092 }
 0x2a8   :  { %v2098_v44 = vsel %vm1059_vm9, %v2089_v56, %v2091_v42  ;;  %v2096_v5 = vsel %vm1059_vm9, %v2093_v17, %v2095_v41  ;;  %v2097_v31 = vsel %vm1059_vm9, %v2091_v42, %v2093_v17 }
 0x2a9   :  { %v2100_v9 = vmul.f32 %v2815_v7, %v2098_v44  ;;  %v2101_v23 = vmul.f32 %v2820_v14, %v2097_v31  ;;  %v2102_v37 = vmul.f32 %v2827_v16, %v2096_v5 }
 0x2ab   :  { %2356 = vmatpush.msk.msra.mxu0 %vm1214_vm10, %v2100_v9  ;;  %2358 = vmatpush.msk.msra.mxu1 %vm1214_vm10, %v2101_v23 }
 0x2ac   :  { %2360 = vmatpush.msk.msra.mxu2 %vm1214_vm10, %v2102_v37  ;;  %2357 = vmatmul.msk.f32.vlgmr.msra.gmra.mxu0 %vm1210_vm11, %v2355_v30 }
 0x2ad   :  { %2359 = vmatmul.msk.f32.vlgmr.msra.gmra.mxu1 %vm1210_vm11, %v2355_v30  ;;  %2361 = vmatmul.msk.f32.vlgmr.msra.gmra.mxu2 %vm1210_vm11, %v2355_v30 }
 0x2d9   :  { %v1264_v38 = vpop.f32.mrf.mxu1 }
 0x2e3   :  { %v1244_v43 = vpop.f32.mrf.mxu0 }
 0x2e7   :  { %v1284_v39 = vpop.f32.mrf.mxu2 }
 0x2e8   :  { %v1304_v7 = vpop.f32.mrf.mxu3 }
 0x2ea   :  { %v1359_v48 = vpop.f32.mrf.mxu1 }
 0x2eb   :  { %v1339_v14 = vpop.f32.mrf.mxu0  ;;  %v1360_v15 = vadd.f32 %v1359_v48, %v1264_v38 }
 0x2ec   :  { %v1340_v61 = vadd.f32 %v1339_v14, %v1244_v43  ;;  %v2209_v43 = vpop.permute.xlu2 %2208 }
 0x2ef   :  { %v1379_v46 = vpop.f32.mrf.mxu2 }
 0x2f0   :  { %v1399_v16 = vpop.f32.mrf.mxu3  ;;  %v1380_v12 = vadd.f32 %v1379_v46, %v1284_v39 }
 0x2f1   :  { %v1400_v54 = vadd.f32 %v1399_v16, %v1304_v7 }
 0x2f3   :  { %v1452_v4 = vpop.f32.mrf.mxu0  ;;  %v1472_v52 = vpop.f32.mrf.mxu1 }
 0x2f4   :  { %v1515_v2 = vadd.f32 %v1452_v4, %v1340_v61  ;;  %v1516_v36 = vadd.f32 %v1472_v52, %v1360_v15 }
 0x2f8   :  { %v1492_v49 = vpop.f32.mrf.mxu2  ;;  %v1512_v51 = vpop.f32.mrf.mxu3 }
 0x2f9   :  { %v1518_v50 = vadd.f32 %v1512_v51, %v1400_v54  ;;  %v1517_v56 = vadd.f32 %v1492_v49, %v1380_v12 }
 0x301   :  { %v1609_v25 = vpop.f32.mrf.mxu2  ;;  %v1629_v26 = vpop.f32.mrf.mxu3 }
 0x302   :  { %v1569_v45 = vpop.f32.mrf.mxu0  ;;  %v1589_v59 = vpop.f32.mrf.mxu1  ;;  %v1635_v63 = vadd.f32 %v1629_v26, %v1518_v50  ;;  %v1634_v11 = vadd.f32 %v1609_v25, %v1517_v56 }
 0x303   :  { %v1632_v13 = vadd.f32 %v1569_v45, %v1515_v2  ;;  %v1633_v18 = vadd.f32 %v1589_v59, %v1516_v36 }
 0x309   :  { %v1710_v60 = vpop.f32.mrf.mxu2 }
 0x30a   :  { %v1670_v57 = vpop.f32.mrf.mxu0  ;;  %v1730_v3 = vpop.f32.mrf.mxu3  ;;  %v1735_v24 = vadd.f32 %v1710_v60, %v1634_v11 }
 0x30b   :  { %v1690_v28 = vpop.f32.mrf.mxu1  ;;  %v1733_v29 = vadd.f32 %v1670_v57, %v1632_v13  ;;  %v1736_v35 = vadd.f32 %v1730_v3, %v1635_v63 }
 0x30c   :  { %v1734_v40 = vadd.f32 %v1690_v28, %v1633_v18 }
 0x311   :  { %v1827_v32 = vpop.f32.mrf.mxu2 }
 0x312   :  { %v1787_v53 = vpop.f32.mrf.mxu0  ;;  %v1847_v0 = vpop.f32.mrf.mxu3  ;;  %v1852_v9 = vadd.f32 %v1827_v32, %v1735_v24 }
 0x313   :  { %v1807_v6 = vpop.f32.mrf.mxu1  ;;  %v1850_v41 = vadd.f32 %v1787_v53, %v1733_v29  ;;  %v1853_v55 = vadd.f32 %v1847_v0, %v1736_v35 }
 0x314   :  { %v1851_v10 = vadd.f32 %v1807_v6, %v1734_v40 }
 0x319   :  { %v1944_v33 = vpop.f32.mrf.mxu2 }
 0x31a   :  { %v1904_v58 = vpop.f32.mrf.mxu0  ;;  %v1964_v62 = vpop.f32.mrf.mxu3  ;;  %v1969_v38 = vadd.f32 %v1944_v33, %v1852_v9 }
 0x31b   :  { %v1924_v47 = vpop.f32.mrf.mxu1  ;;  %v1967_v34 = vadd.f32 %v1904_v58, %v1850_v41  ;;  %v1970_v19 = vadd.f32 %v1964_v62, %v1853_v55 }
 0x31c   :  { %v1968_v20 = vadd.f32 %v1924_v47, %v1851_v10 }
 0x321   :  { %v2061_v21 = vpop.f32.mrf.mxu2 }
 0x322   :  { %v2021_v27 = vpop.f32.mrf.mxu0  ;;  %v2081_v1 = vpop.f32.mrf.mxu3  ;;  %v2086_v14 = vadd.f32 %v2061_v21, %v1969_v38 }
 0x323   :  { %v2041_v8 = vpop.f32.mrf.mxu1  ;;  %v2084_v22 = vadd.f32 %v2021_v27, %v1967_v34  ;;  %v2087_v30 = vadd.f32 %v2081_v1, %v1970_v19 }
 0x324   :  { %v2085_v42 = vadd.f32 %v2041_v8, %v1968_v20 }
 0x32a   :  { %v2138_v17 = vpop.f32.mrf.mxu0  ;;  %v2198_v44 = vpop.f32.mrf.mxu3 }
 0x32b   :  { %v2201_v5 = vadd.f32 %v2138_v17, %v2084_v22  ;;  %v2158_v31 = vpop.f32.mrf.mxu1  ;;  %v2204_v23 = vadd.f32 %v2198_v44, %v2087_v30 }
 0x32c   :  { %v2202_v37 = vadd.f32 %v2158_v31, %v2085_v42 }
 0x32d   :  { %v2214_v39 = vadd.f32 %v2209_v43, %v2204_v23  ;;  %v2211_v7 = vadd.f32 %v2209_v43, %v2201_v5 }
 0x32e   :  { %v2212_v46 = vadd.f32 %v2209_v43, %v2202_v37 }
 0x32f   :  { %v2218_v49 = vmax.f32 %v2214_v39, 0.0  ;;  %v2215_v51 = vmax.f32 %v2211_v7, 0.0 }
 0x330   :  { %v2216_v48 = vmax.f32 %v2212_v46, 0.0  ;;  %v2178_v16 = vpop.f32.mrf.mxu2 }
 0x331   :  { %v2203_v52 = vadd.f32 %v2178_v16, %v2086_v14  ;;  %v2224_v45 = vrot.slane %v2218_v49, 4 }
 0x332   :  { %v2223_v4 = vrot.slane %v2216_v48, 4 }
 0x333   :  { %v2213_v26 = vadd.f32 %v2209_v43, %v2203_v52 }
 0x334   :  { %v2225_v25 = vsel %vm1214_vm10, %v2215_v51, %v2223_v4 }
 0x335   :  { %2229 = vst [vmem:[%s3175_s8] sm:$0xff] %v2225_v25  ;;  %v2217_v59 = vmax.f32 %v2213_v26, 0.0 }
 0x337   :  { %v2226_v60 = vsel %vm1214_vm10, %v2217_v59, %v2224_v45 }
 0x338   :  { %2230 = vst [vmem:[%s3175_s8 + $0x8] sm:$0xff] %v2226_v60 }

</bundles_post_ra>
